<compile_context>
chip_gen: v6e
topology: v6e:2x2x1
jax: 0.10.0
libtpu: 0.0.40
codegen_flags: <defaults>
</compile_context>

<pallas_src>
import functools

import jax
import jax.numpy as jnp
from jax.experimental import pallas as pl
from jax.experimental.pallas import tpu as pltpu

MATMUL_DTYPE = jnp.bfloat16   # MXU operand / inter-layer activation dtype
LANE = 128


def _round_up(v, m):
    return (v + m - 1) // m * m


def _pick_depth_group(D, plane, in_lanes, *, max_rows=2048, max_window_bytes=8 << 20):
    """Largest divisor G of D s.t. one grid step (G output planes, (G+2)-plane
    input window) stays within bounded row / byte budgets (v7x-safe VMEM)."""
    bpe = jnp.dtype(MATMUL_DTYPE).itemsize
    best = 1
    for g in range(1, D + 1):
        if D % g:
            continue
        if g * plane > max_rows:
            continue
        if (g + 2) * plane * in_lanes * bpe > max_window_bytes:
            continue
        best = g
    return best


# ---------------------------------------------------------------------------
# Fused ReplPad(1) + Conv3d(k=3) + bias + LeakyReLU kernel
# (one grid step = G consecutive output depth planes of one batch element).
# ---------------------------------------------------------------------------
def _fused_conv_kernel(neg_slope, plane, G, H, W, x_ref, w_ref, b_ref, o_ref):
    """x_ref: (1, (G+2)*plane, 9*Cin) bf16 — edge-padded, (kh,kw)-tap-interleaved,
              depth-windowed rows (plane row index = h*Wp + w).
       w_ref: (3, 9*Cin, Cout_mxu)  bf16 — one weight slab per kd tap, Cout
              zero-padded to a 128-lane multiple (MXU-dense, numerically free).
       b_ref: (1, Cout_mxu) f32
       o_ref: (1, G*plane, Cout)    — only rows [0, M) are written; tail rows
              and per-plane (h>=H / w>=W) rows are junk and discarded on host."""
    Wp = W + 2
    M = (G - 1) * plane + (H - 1) * Wp + W        # rows covering all valid outputs
    Cout = o_ref.shape[2]

    # 3 accumulating matmuls (one per kd) — no in-kernel lane concatenation.
    acc = jnp.dot(x_ref[0, 0:M, :], w_ref[0], preferred_element_type=jnp.float32)
    acc += jnp.dot(x_ref[0, plane:plane + M, :], w_ref[1],
                   preferred_element_type=jnp.float32)
    acc += jnp.dot(x_ref[0, 2 * plane:2 * plane + M, :], w_ref[2],
                   preferred_element_type=jnp.float32)

    acc = acc + b_ref[...]                              # f32 epilogue (v5e-safe)
    acc = jnp.where(acc >= 0.0, acc, neg_slope * acc)   # LeakyReLU
    # Store only the real output channels (lane-slice before the HBM write).
    o_ref[0, 0:M, :] = acc[:, :Cout].astype(o_ref.dtype)


# ---------------------------------------------------------------------------
# Host-side layout prep: edge pad + (kh,kw) tap interleave + depth windows.
# ---------------------------------------------------------------------------
def _prep_input(x_cl, G):
    """x_cl: (N, D, H, W, C) channels-last.
    Returns (N*(D//G), (G+2)*Hp*Wp, 9*C) bf16, where lane (kh*3+kw)*C + c of
    padded-plane row (h, w) holds x_edge_padded[h+kh, w+kw, c]."""
    x_cl = x_cl.astype(MATMUL_DTYPE)
    N, D, H, W, C = x_cl.shape
    Hp, Wp = H + 2, W + 2
    # Replication ("edge") padding on D/H/W.
    xp = jnp.pad(x_cl, ((0, 0), (1, 1), (1, 1), (1, 1), (0, 0)), mode="edge")
    # Zero-pad 2 extra rows/cols at the high end so every (kh, kw) shifted view
    # has full (Hp, Wp) extent (the extra entries only feed discarded junk rows).
    xpp = jnp.pad(xp, ((0, 0), (0, 0), (0, 2), (0, 2), (0, 0)))
    taps = [xpp[:, :, kh:kh + Hp, kw:kw + Wp, :]
            for kh in range(3) for kw in range(3)]
    x9 = jnp.stack(taps, axis=-2).reshape(N, D + 2, Hp * Wp, 9 * C)
    # Pre-windowed depth groups: group g needs padded planes [g*G, g*G + G + 2),
    # materialized contiguously so one plain Blocked BlockSpec covers it.
    ngroups = D // G
    wins = [x9[:, g * G:g * G + G + 2] for g in range(ngroups)]
    xw = jnp.stack(wins, axis=1)                  # (N, ngroups, G+2, Hp*Wp, 9C)
    return xw.reshape(N * ngroups, (G + 2) * Hp * Wp, 9 * C)


def conv3d_repl_leakyrelu(x_cl, w, b, neg_slope, out_dtype):
    """x_cl: (N, D, H, W, Cin) channels-last; w: (Cout, Cin, 3, 3, 3); b: (Cout,).
    Returns (N, D, Hp, Wp, Cout) channels-last; valid region is [:, :, :H, :W, :]."""
    N, D, H, W, C = x_cl.shape
    Cout = w.shape[0]
    Hp, Wp = H + 2, W + 2
    plane = Hp * Wp
    G = _pick_depth_group(D, plane, 9 * C)
    ngroups = D // G
    Cout_mxu = _round_up(Cout, LANE)

    xw = _prep_input(x_cl, G)
    # (Cout, Cin, kd, kh, kw) -> (kd, (kh, kw, cin), Cout); zero-pad Cout for MXU.
    w3 = jnp.transpose(w, (2, 3, 4, 1, 0)).reshape(3, 9 * C, Cout)
    w3 = jnp.pad(w3, ((0, 0), (0, 0), (0, Cout_mxu - Cout))).astype(MATMUL_DTYPE)
    b2 = jnp.pad(b.reshape(1, Cout),
                 ((0, 0), (0, Cout_mxu - Cout))).astype(jnp.float32)

    kernel = functools.partial(_fused_conv_kernel, float(neg_slope), plane, G, H, W)
    out = pl.pallas_call(
        kernel,
        out_shape=jax.ShapeDtypeStruct((N * ngroups, G * plane, Cout), out_dtype),
        grid=(N * ngroups,),
        in_specs=[
            pl.BlockSpec((1, (G + 2) * plane, 9 * C), lambda i: (i, 0, 0)),
            pl.BlockSpec((3, 9 * C, Cout_mxu), lambda i: (0, 0, 0)),
            pl.BlockSpec((1, Cout_mxu), lambda i: (0, 0)),
        ],
        out_specs=pl.BlockSpec((1, G * plane, Cout), lambda i: (i, 0, 0)),
        compiler_params=pltpu.CompilerParams(
            dimension_semantics=("parallel",),
            vmem_limit_bytes=48 * 1024 * 1024,
        ),
    )(xw, w3, b2)
    return out.reshape(N, D, Hp, Wp, Cout)


# ---------------------------------------------------------------------------
# Downconv3d forward
# ---------------------------------------------------------------------------
def downconv3d_forward(x, params, a):
    """x: (N, C, D, H, W) NCDHW, like the PyTorch module."""
    N, C, D, H, W = x.shape
    # AvgPool3d(2): floor odd dims (PyTorch semantics), pair-mean reductions
    # fused by XLA with the NCDHW -> channels-last transpose.
    D2, H2, W2 = D // 2, H // 2, W // 2
    xe = x[:, :, :2 * D2, :2 * H2, :2 * W2]
    xpool = xe.reshape(N, C, D2, 2, H2, 2, W2, 2).mean(axis=(3, 5, 7))
    x_cl = jnp.transpose(xpool, (0, 2, 3, 4, 1))             # (N, D2, H2, W2, C)

    # Conv1 emits bf16 (its only consumer casts to bf16 anyway) — halves the
    # dominant output HBM stream; conv2 emits f32 for the final result.
    y1 = conv3d_repl_leakyrelu(x_cl, params["w1"], params["b1"], a,
                               out_dtype=MATMUL_DTYPE)
    y1 = y1[:, :, :H2, :W2, :]                               # drop border junk
    y2 = conv3d_repl_leakyrelu(y1, params["w2"], params["b2"], a,
                               out_dtype=jnp.float32)
    y2 = y2[:, :, :H2, :W2, :]
    return jnp.transpose(y2, (0, 4, 1, 2, 3))                # back to NCDHW


def init_params(key, in_ch, out_ch):
    k1, k2, k3, k4 = jax.random.split(key, 4)
    fan_in = in_ch * 27
    bound = 1.0 / jnp.sqrt(float(fan_in))  # PyTorch Conv default init scale
    return {
        "w1": jax.random.uniform(k1, (in_ch, in_ch, 3, 3, 3), jnp.float32, -bound, bound),
        "b1": jax.random.uniform(k2, (in_ch,), jnp.float32, -bound, bound),
        "w2": jax.random.uniform(k3, (out_ch, in_ch, 3, 3, 3), jnp.float32, -bound, bound),
        "b2": jax.random.uniform(k4, (out_ch,), jnp.float32, -bound, bound),
    }


# Pure-JAX f32 reference (correctness sanity check only).
def _ref_forward(x, params, a):
    def conv(x, w, b):
        xp = jnp.pad(x, ((0, 0), (0, 0), (1, 1), (1, 1), (1, 1)), mode="edge")
        y = jax.lax.conv_general_dilated(
            xp, w, (1, 1, 1), "VALID",
            dimension_numbers=("NCDHW", "OIDHW", "NCDHW"))
        return y + b.reshape(1, -1, 1, 1, 1)

    def lrelu(v):
        return jnp.where(v >= 0, v, a * v)

    N, C, D, H, W = x.shape
    D2, H2, W2 = D // 2, H // 2, W // 2
    xe = x[:, :, :2 * D2, :2 * H2, :2 * W2]
    xpool = xe.reshape(N, C, D2, 2, H2, 2, W2, 2).mean(axis=(3, 5, 7))
    y = lrelu(conv(xpool, params["w1"], params["b1"]))
    y = lrelu(conv(y, params["w2"], params["b2"]))
    return y


if __name__ == "__main__":
    in_ch, out_ch, a = 4, 8, 0.1
    key = jax.random.PRNGKey(0)
    kx, kp = jax.random.split(key)
    x = jax.random.normal(kx, (2, in_ch, 8, 8, 8), jnp.float32)  # NCDHW
    params = init_params(kp, in_ch, out_ch)

    fwd = jax.jit(functools.partial(downconv3d_forward, a=a))
    out = jax.block_until_ready(fwd(x, params))
    assert out.shape == (2, out_ch, 4, 4, 4), out.shape

    ref = jax.block_until_ready(_ref_forward(x, params, a))
    err = float(jnp.max(jnp.abs(out - ref)))
    # bf16 MXU operands / bf16 inter-layer activation => loosened tolerance.
    assert jnp.allclose(out, ref, atol=2e-2, rtol=2e-2), err
    print("KERNEL_OK")
</pallas_src>

<mosaic_0001>
module attributes {stable_mosaic.version = 11 : i64} {
  func.func @_fused_conv_kernel(%arg0: i32, %arg1: memref<1x216x36xbf16, #tpu.memory_space<vmem>>, %arg2: memref<3x36x128xbf16, #tpu.memory_space<vmem>>, %arg3: memref<1x128xf32, #tpu.memory_space<vmem>>, %arg4: memref<1x144x4xbf16, #tpu.memory_space<vmem>>) attributes {dimension_semantics = [#tpu.dimension_semantics<parallel>], iteration_bounds = array<i64: 2>, scalar_prefetch = 0 : i64, scratch_operands = 0 : i64, tpu.core_type = #tpu.core_type<tc>, window_params = [{transform_indices = @transform_0, window_bounds = array<i64: 1, 216, 36>}, {pipeline_mode = #tpu.pipeline_mode<synchronous>, transform_indices = @transform_1, window_bounds = array<i64: 3, 36, 128>}, {pipeline_mode = #tpu.pipeline_mode<synchronous>, transform_indices = @transform_2, window_bounds = array<i64: 1, 128>}, {transform_indices = @transform_3, window_bounds = array<i64: 1, 144, 4>}]} {
    %c0 = arith.constant 0 : index
    %c0_0 = arith.constant 0 : index
    %c0_1 = arith.constant 0 : index
    %0 = vector.load %arg1[%c0, %c0_0, %c0_1] : memref<1x216x36xbf16, #tpu.memory_space<vmem>>, vector<1x130x36xbf16>
    %1 = vector.shape_cast %0 : vector<1x130x36xbf16> to vector<130x36xbf16>
    %c0_2 = arith.constant 0 : index
    %c0_3 = arith.constant 0 : index
    %c0_4 = arith.constant 0 : index
    %2 = vector.load %arg2[%c0_2, %c0_3, %c0_4] : memref<3x36x128xbf16, #tpu.memory_space<vmem>>, vector<1x36x128xbf16>
    %3 = vector.shape_cast %2 : vector<1x36x128xbf16> to vector<36x128xbf16>
    %cst = arith.constant dense<0.000000e+00> : vector<130x128xf32>
    %4 = tpu.matmul %1, %3, %cst {dimension_numbers = #tpu.dot_dimension_numbers<[1], [0], [0], [1], [0, 0, 1, 1], [], []>} : vector<130x36xbf16>, vector<36x128xbf16>, vector<130x128xf32> -> vector<130x128xf32>
    %c0_5 = arith.constant 0 : index
    %c36 = arith.constant 36 : index
    %c0_6 = arith.constant 0 : index
    %5 = vector.load %arg1[%c0_5, %c36, %c0_6] : memref<1x216x36xbf16, #tpu.memory_space<vmem>>, vector<1x130x36xbf16>
    %6 = vector.shape_cast %5 : vector<1x130x36xbf16> to vector<130x36xbf16>
    %c1 = arith.constant 1 : index
    %c0_7 = arith.constant 0 : index
    %c0_8 = arith.constant 0 : index
    %7 = vector.load %arg2[%c1, %c0_7, %c0_8] : memref<3x36x128xbf16, #tpu.memory_space<vmem>>, vector<1x36x128xbf16>
    %8 = vector.shape_cast %7 : vector<1x36x128xbf16> to vector<36x128xbf16>
    %cst_9 = arith.constant dense<0.000000e+00> : vector<130x128xf32>
    %9 = tpu.matmul %6, %8, %cst_9 {dimension_numbers = #tpu.dot_dimension_numbers<[1], [0], [0], [1], [0, 0, 1, 1], [], []>} : vector<130x36xbf16>, vector<36x128xbf16>, vector<130x128xf32> -> vector<130x128xf32>
    %10 = arith.addf %4, %9 : vector<130x128xf32>
    %c0_10 = arith.constant 0 : index
    %c72 = arith.constant 72 : index
    %c0_11 = arith.constant 0 : index
    %11 = vector.load %arg1[%c0_10, %c72, %c0_11] : memref<1x216x36xbf16, #tpu.memory_space<vmem>>, vector<1x130x36xbf16>
    %12 = vector.shape_cast %11 : vector<1x130x36xbf16> to vector<130x36xbf16>
    %c2 = arith.constant 2 : index
    %c0_12 = arith.constant 0 : index
    %c0_13 = arith.constant 0 : index
    %13 = vector.load %arg2[%c2, %c0_12, %c0_13] : memref<3x36x128xbf16, #tpu.memory_space<vmem>>, vector<1x36x128xbf16>
    %14 = vector.shape_cast %13 : vector<1x36x128xbf16> to vector<36x128xbf16>
    %cst_14 = arith.constant dense<0.000000e+00> : vector<130x128xf32>
    %15 = tpu.matmul %12, %14, %cst_14 {dimension_numbers = #tpu.dot_dimension_numbers<[1], [0], [0], [1], [0, 0, 1, 1], [], []>} : vector<130x36xbf16>, vector<36x128xbf16>, vector<130x128xf32> -> vector<130x128xf32>
    %16 = arith.addf %10, %15 : vector<130x128xf32>
    %c0_15 = arith.constant 0 : index
    %c0_16 = arith.constant 0 : index
    %17 = vector.load %arg3[%c0_15, %c0_16] : memref<1x128xf32, #tpu.memory_space<vmem>>, vector<1x128xf32>
    %18 = vector.broadcast %17 : vector<1x128xf32> to vector<130x128xf32>
    %19 = arith.addf %16, %18 : vector<130x128xf32>
    %cst_17 = arith.constant 0.000000e+00 : f32
    %20 = vector.broadcast %cst_17 : f32 to vector<130x128xf32>
    %21 = arith.cmpf oge, %19, %20 : vector<130x128xf32>
    %cst_18 = arith.constant 1.000000e-01 : f32
    %22 = vector.broadcast %cst_18 : f32 to vector<130x128xf32>
    %23 = arith.mulf %22, %19 : vector<130x128xf32>
    %24 = arith.select %21, %19, %23 : vector<130x128xi1>, vector<130x128xf32>
    %25 = vector.extract_strided_slice %24 {offsets = [0, 0], sizes = [130, 4], strides = [1, 1]} : vector<130x128xf32> to vector<130x4xf32>
    %26 = arith.truncf %25 : vector<130x4xf32> to vector<130x4xbf16>
    %c0_19 = arith.constant 0 : index
    %c0_20 = arith.constant 0 : index
    %c0_21 = arith.constant 0 : index
    %27 = vector.load %arg4[%c0_19, %c0_20, %c0_21] : memref<1x144x4xbf16, #tpu.memory_space<vmem>>, vector<1x130x4xbf16>
    %28 = vector.shape_cast %27 : vector<1x130x4xbf16> to vector<130x4xbf16>
    %29 = vector.shape_cast %26 : vector<130x4xbf16> to vector<1x130x4xbf16>
    tpu.vector_store %arg4[%c0_19, %c0_20, %c0_21], %29 {strides = array<i32>} : memref<1x144x4xbf16, #tpu.memory_space<vmem>>, vector<1x130x4xbf16>,
    return
  }
  func.func @transform_0(%arg0: i32) -> (i32, i32, i32) {
    %c0_i32 = arith.constant 0 : i32
    %c0_i32_0 = arith.constant 0 : i32
    %c0_i32_1 = arith.constant 0 : i32
    return %arg0, %c0_i32, %c0_i32_0 : i32, i32, i32
  }
  func.func @transform_1(%arg0: i32) -> (i32, i32, i32) {
    %c0_i32 = arith.constant 0 : i32
    %c0_i32_0 = arith.constant 0 : i32
    %c0_i32_1 = arith.constant 0 : i32
    %c0_i32_2 = arith.constant 0 : i32
    return %c0_i32, %c0_i32_0, %c0_i32_1 : i32, i32, i32
  }
  func.func @transform_2(%arg0: i32) -> (i32, i32) {
    %c0_i32 = arith.constant 0 : i32
    %c0_i32_0 = arith.constant 0 : i32
    %c0_i32_1 = arith.constant 0 : i32
    return %c0_i32, %c0_i32_0 : i32, i32
  }
  func.func @transform_3(%arg0: i32) -> (i32, i32, i32) {
    %c0_i32 = arith.constant 0 : i32
    %c0_i32_0 = arith.constant 0 : i32
    %c0_i32_1 = arith.constant 0 : i32
    return %arg0, %c0_i32, %c0_i32_0 : i32, i32, i32
  }
}

module attributes {stable_mosaic.version = 11 : i64} {
  func.func @_fused_conv_kernel(%arg0: i32, %arg1: memref<1x216x36xbf16, #tpu.memory_space<vmem>>, %arg2: memref<3x36x128xbf16, #tpu.memory_space<vmem>>, %arg3: memref<1x128xf32, #tpu.memory_space<vmem>>, %arg4: memref<1x144x8xf32, #tpu.memory_space<vmem>>) attributes {dimension_semantics = [#tpu.dimension_semantics<parallel>], iteration_bounds = array<i64: 2>, scalar_prefetch = 0 : i64, scratch_operands = 0 : i64, tpu.core_type = #tpu.core_type<tc>, window_params = [{transform_indices = @transform_0, window_bounds = array<i64: 1, 216, 36>}, {pipeline_mode = #tpu.pipeline_mode<synchronous>, transform_indices = @transform_1, window_bounds = array<i64: 3, 36, 128>}, {pipeline_mode = #tpu.pipeline_mode<synchronous>, transform_indices = @transform_2, window_bounds = array<i64: 1, 128>}, {transform_indices = @transform_3, window_bounds = array<i64: 1, 144, 8>}]} {
    %c0 = arith.constant 0 : index
    %c0_0 = arith.constant 0 : index
    %c0_1 = arith.constant 0 : index
    %0 = vector.load %arg1[%c0, %c0_0, %c0_1] : memref<1x216x36xbf16, #tpu.memory_space<vmem>>, vector<1x130x36xbf16>
    %1 = vector.shape_cast %0 : vector<1x130x36xbf16> to vector<130x36xbf16>
    %c0_2 = arith.constant 0 : index
    %c0_3 = arith.constant 0 : index
    %c0_4 = arith.constant 0 : index
    %2 = vector.load %arg2[%c0_2, %c0_3, %c0_4] : memref<3x36x128xbf16, #tpu.memory_space<vmem>>, vector<1x36x128xbf16>
    %3 = vector.shape_cast %2 : vector<1x36x128xbf16> to vector<36x128xbf16>
    %cst = arith.constant dense<0.000000e+00> : vector<130x128xf32>
    %4 = tpu.matmul %1, %3, %cst {dimension_numbers = #tpu.dot_dimension_numbers<[1], [0], [0], [1], [0, 0, 1, 1], [], []>} : vector<130x36xbf16>, vector<36x128xbf16>, vector<130x128xf32> -> vector<130x128xf32>
    %c0_5 = arith.constant 0 : index
    %c36 = arith.constant 36 : index
    %c0_6 = arith.constant 0 : index
    %5 = vector.load %arg1[%c0_5, %c36, %c0_6] : memref<1x216x36xbf16, #tpu.memory_space<vmem>>, vector<1x130x36xbf16>
    %6 = vector.shape_cast %5 : vector<1x130x36xbf16> to vector<130x36xbf16>
    %c1 = arith.constant 1 : index
    %c0_7 = arith.constant 0 : index
    %c0_8 = arith.constant 0 : index
    %7 = vector.load %arg2[%c1, %c0_7, %c0_8] : memref<3x36x128xbf16, #tpu.memory_space<vmem>>, vector<1x36x128xbf16>
    %8 = vector.shape_cast %7 : vector<1x36x128xbf16> to vector<36x128xbf16>
    %cst_9 = arith.constant dense<0.000000e+00> : vector<130x128xf32>
    %9 = tpu.matmul %6, %8, %cst_9 {dimension_numbers = #tpu.dot_dimension_numbers<[1], [0], [0], [1], [0, 0, 1, 1], [], []>} : vector<130x36xbf16>, vector<36x128xbf16>, vector<130x128xf32> -> vector<130x128xf32>
    %10 = arith.addf %4, %9 : vector<130x128xf32>
    %c0_10 = arith.constant 0 : index
    %c72 = arith.constant 72 : index
    %c0_11 = arith.constant 0 : index
    %11 = vector.load %arg1[%c0_10, %c72, %c0_11] : memref<1x216x36xbf16, #tpu.memory_space<vmem>>, vector<1x130x36xbf16>
    %12 = vector.shape_cast %11 : vector<1x130x36xbf16> to vector<130x36xbf16>
    %c2 = arith.constant 2 : index
    %c0_12 = arith.constant 0 : index
    %c0_13 = arith.constant 0 : index
    %13 = vector.load %arg2[%c2, %c0_12, %c0_13] : memref<3x36x128xbf16, #tpu.memory_space<vmem>>, vector<1x36x128xbf16>
    %14 = vector.shape_cast %13 : vector<1x36x128xbf16> to vector<36x128xbf16>
    %cst_14 = arith.constant dense<0.000000e+00> : vector<130x128xf32>
    %15 = tpu.matmul %12, %14, %cst_14 {dimension_numbers = #tpu.dot_dimension_numbers<[1], [0], [0], [1], [0, 0, 1, 1], [], []>} : vector<130x36xbf16>, vector<36x128xbf16>, vector<130x128xf32> -> vector<130x128xf32>
    %16 = arith.addf %10, %15 : vector<130x128xf32>
    %c0_15 = arith.constant 0 : index
    %c0_16 = arith.constant 0 : index
    %17 = vector.load %arg3[%c0_15, %c0_16] : memref<1x128xf32, #tpu.memory_space<vmem>>, vector<1x128xf32>
    %18 = vector.broadcast %17 : vector<1x128xf32> to vector<130x128xf32>
    %19 = arith.addf %16, %18 : vector<130x128xf32>
    %cst_17 = arith.constant 0.000000e+00 : f32
    %20 = vector.broadcast %cst_17 : f32 to vector<130x128xf32>
    %21 = arith.cmpf oge, %19, %20 : vector<130x128xf32>
    %cst_18 = arith.constant 1.000000e-01 : f32
    %22 = vector.broadcast %cst_18 : f32 to vector<130x128xf32>
    %23 = arith.mulf %22, %19 : vector<130x128xf32>
    %24 = arith.select %21, %19, %23 : vector<130x128xi1>, vector<130x128xf32>
    %25 = vector.extract_strided_slice %24 {offsets = [0, 0], sizes = [130, 8], strides = [1, 1]} : vector<130x128xf32> to vector<130x8xf32>
    %c0_19 = arith.constant 0 : index
    %c0_20 = arith.constant 0 : index
    %c0_21 = arith.constant 0 : index
    %26 = vector.load %arg4[%c0_19, %c0_20, %c0_21] : memref<1x144x8xf32, #tpu.memory_space<vmem>>, vector<1x130x8xf32>
    %27 = vector.shape_cast %26 : vector<1x130x8xf32> to vector<130x8xf32>
    %28 = vector.shape_cast %25 : vector<130x8xf32> to vector<1x130x8xf32>
    tpu.vector_store %arg4[%c0_19, %c0_20, %c0_21], %28 {strides = array<i32>} : memref<1x144x8xf32, #tpu.memory_space<vmem>>, vector<1x130x8xf32>,
    return
  }
  func.func @transform_0(%arg0: i32) -> (i32, i32, i32) {
    %c0_i32 = arith.constant 0 : i32
    %c0_i32_0 = arith.constant 0 : i32
    %c0_i32_1 = arith.constant 0 : i32
    return %arg0, %c0_i32, %c0_i32_0 : i32, i32, i32
  }
  func.func @transform_1(%arg0: i32) -> (i32, i32, i32) {
    %c0_i32 = arith.constant 0 : i32
    %c0_i32_0 = arith.constant 0 : i32
    %c0_i32_1 = arith.constant 0 : i32
    %c0_i32_2 = arith.constant 0 : i32
    return %c0_i32, %c0_i32_0, %c0_i32_1 : i32, i32, i32
  }
  func.func @transform_2(%arg0: i32) -> (i32, i32) {
    %c0_i32 = arith.constant 0 : i32
    %c0_i32_0 = arith.constant 0 : i32
    %c0_i32_1 = arith.constant 0 : i32
    return %c0_i32, %c0_i32_0 : i32, i32
  }
  func.func @transform_3(%arg0: i32) -> (i32, i32, i32) {
    %c0_i32 = arith.constant 0 : i32
    %c0_i32_0 = arith.constant 0 : i32
    %c0_i32_1 = arith.constant 0 : i32
    return %arg0, %c0_i32, %c0_i32_0 : i32, i32, i32
  }
}

</mosaic_0001>

<bundles_post_ra>
// kernel: downconv3d_forward.2
= control target key start
LH: loop header
LB: loop body
LE: loop exit
PB: predicated region body
PF: predicated region fallthrough
CT: control target
= control target key end

     0   :  { %s1386_s12 = smov 0   ;;  %s1675_s0 = inlined_call_operand.vmem [shape: bf16[2,216,36], index: 0, kind: input, shape index: {}]   ;;  %s1676_s1 = inlined_call_operand.vmem [shape: bf16[3,36,128], index: 1, kind: input, shape index: {}]   ;;  %s1677_s2 = inlined_call_operand.vmem [shape: f32[1,128], index: 2, kind: input, shape index: {}]   ;;  %s1678_s3 = inlined_call_operand.vmem [shape: bf16[2,144,4], index: 3, kind: output, shape index: {}]  }
   0x1 LB: > { %s1033_s13 = sadd.s32 4294967295, %s1362_s12   ;;  %p1037_p0 = scmp.ge.s32.totalorder %s1362_s12, 1  ;;  %s1362_s12 = sphi %s1386_s12, %s13_s12  }
   0x2   : > { %p137_p1 = scmp.lt.s32.totalorder %s1362_s12, 3 }
   0x4   : > { %p138_p2 = pnand %p1037_p0, %p137_p1 }
   0x5   : > { %p161_p3 = scmp.lt.s32.totalorder (!%p138_p2), %s1033_s13, 1 }
   0x6   : > { %141 = sbr.rel (%p138_p2) target bundleno = 331 (0x14b), region = 32 }
   0xb   : > { %v1325_v0 = vld [vmem:[%s1676_s1 + $0x24] ss:$0 sps:$4 sm:$0x33]   ;;  %v1364_v1 = vmov 0.0   ;;  %vm310_vm0 = vcmask 1041408   ;;  %v1326_v3 = vld [vmem:[%s1676_s1 + $0x1c] sm:$0xff]  }
   0xc   : > { %1181 = vmatprep.subr.bf16.mxu0 %v1364_v1  ;;  %1307 = vmatprep.subr.bf16.mxu1 %v1364_v1  ;;  %v312_v2 = vsel %vm310_vm0, %v1325_v0, 0  ;;  %vm1365_vm1 = vmmov 0   ;;  %s1680_s13 = smov (!%p161_p3, %s1033_s13), 1  ;;  %v1327_v4 = vld [vmem:[%s1676_s1 + $0x14] sm:$0xff]   ;;  %vm249_vm2 = vcmask 1045504   ;;  %vm282_vm3 = vcmask 293888  }
   0xd   : > { %1182 = vmatpush3.bf16.msra.mxu0 %v312_v2  ;;  %1310 = vmatpush3.bf16.msra.mxu1 %v312_v2  ;;  %s1313_s20 = smul.u32 108, %s1680_s13  ;;  %v1332_v5 = vld [vmem:[%s1676_s1 + $0x38] ss:$0 sps:$4 sm:$0x33]   ;;  %v1336_v24 = vld [vmem:[%s1676_s1 + $0x30] sm:$0xff]   ;;  %v1339_v26 = vld [vmem:[%s1676_s1 + $0x8] sm:$0xff]  }
   0xe   : > { %1183 = vmatprep.subr.bf16.mxu0 %v1364_v1  ;;  %1308 = vmatprep.subr.bf16.mxu1 %v1364_v1  ;;  %v1333_v9 = vld [vmem:[%s1676_s1 + $0x10] ss:$0 sps:$4 sm:$0x33]   ;;  %v692_v18 = vsel %vm310_vm0, %v1332_v5, 0  ;;  %v1341_v31 = vld [vmem:[%s1676_s1 + $0x28] sm:$0xff]   ;;  %v1342_v32 = vld [vmem:[%s1676_s1] sm:$0xff]  }
   0xf   : > { %1187 = vmatprep.mubr.msk.bf16.mxu0 %vm1365_vm1, %v1364_v1  ;;  %1207 = vmatprep.mubr.msk.bf16.mxu1 %vm1365_vm1, %v1364_v1  ;;  %s1420_s23 = scalar_lea.vmem %s1675_s0, %s1313_s20  ;;  %v477_v22 = vsel %vm310_vm0, %v1333_v9, 0  ;;  %s1314_s11 = smul.u32 72, %s1680_s13  ;;  %vm959_vm5 = vcmask 27648  }
  0x10   : > { %v1426_v6 = vld [vmem:[%s1420_s23 + $0x14] sm:$0xf]  ;;  %v194_v7 = vld [vmem:[%s1420_s23 + $0x10] sm:$0xc]  ;;  %v1430_v8 = vld [vmem:[%s1420_s23 + $0x18] sm:$0xff]  }
  0x11   : > { %1184 = vmatpush3.bf16.msra.mxu0 %v1326_v3  ;;  %1311 = vmatpush3.bf16.msra.mxu1 %v1326_v3  ;;  %v1045_v10 = vcombine.low %v194_v7, %v1426_v6  ;;  %v251_v11 = vrot.slane %v1430_v8, 2  ;;  %v1440_v12 = vld [vmem:[%s1420_s23 + $0x38] sm:$0xff]   ;;  %v1331_v13 = vld [vmem:[%s1420_s23 + $0x40] sm:$0xff]   ;;  %v1335_v19 = vld [vmem:[%s1420_s23 + $0x48] sm:$0xff]   ;;  %s1608_s16 = scalar_lea.vmem %s1678_s3, %s1314_s11 }
  0x12   : > { %1185 = vmatprep.subr.bf16.mxu0 %v1364_v1  ;;  %1309 = vmatprep.subr.bf16.mxu1 %v1364_v1  ;;  %v1444_v15 = vld [vmem:[%s1420_s23 + $0x20] sm:$0xff]   ;;  %v259_v16 = vrot.slane %v1440_v12, 2  ;;  %v261_v17 = vrot.slane %v1331_v13, 2  ;;  %v263_v25 = vrot.slane %v1335_v19, 2  ;;  %v1337_v29 = vld [vmem:[%s1420_s23 + $0x28] sm:$0xff]   ;;  %v1340_v36 = vld [vmem:[%s1420_s23 + $0x30] sm:$0xff]  }
  0x13   : > { %v250_v14 = vrot.slane %v1045_v10, 2  ;;  %v253_v23 = vrot.slane %v1444_v15, 2  ;;  %v1338_v27 = vld [vmem:[%s1420_s23 + $0x50] ss:$0 sps:$4 sm:$0x77]   ;;  %v255_v33 = vrot.slane %v1337_v29, 2 }
  0x14   : > { %v262_v21 = vsel %vm249_vm2, %v259_v16, %v261_v17  ;;  %v264_v30 = vsel %vm249_vm2, %v261_v17, %v263_v25  ;;  %v265_v34 = vrot.slane %v1338_v27, 2  ;;  %v257_v38 = vrot.slane %v1340_v36, 2  ;;  %v1343_v41 = vld [vmem:[%s1420_s23] sm:$0xff]   ;;  %v1344_v43 = vld [vmem:[%s1420_s23 + $0x8] sm:$0xff]   ;;  %v176_v44 = vld [vmem:[%s1420_s23 + $0x10] sm:$0xf] }
  0x15   : > { %1186 = vmatpush3.bf16.msra.mxu0 %v1327_v4  ;;  %1312 = vmatpush3.bf16.msra.mxu1 %v1327_v4  ;;  %v252_v20 = vsel %vm249_vm2, %v250_v14, %v251_v11  ;;  %v254_v28 = vsel %vm249_vm2, %v251_v11, %v253_v23  ;;  %v256_v35 = vsel %vm249_vm2, %v253_v23, %v255_v33  ;;  %v1345_v42 = vld [vmem:[%s1420_s23 + $0x24] sm:$0xff]   ;;  %v1347_v45 = vld [vmem:[%s1420_s23 + $0x2c] sm:$0xff]   ;;  %v1348_v47 = vld [vmem:[%s1420_s23 + $0x34] sm:$0xff]  }
  0x16   : > { %1265 = vmatprep.subr.bf16.mxu0 %v1364_v1  ;;  %1223 = vmatprep.subr.bf16.mxu1 %v1364_v1  ;;  %v266_v37 = vsel %vm249_vm2, %v263_v25, %v265_v34  ;;  %v258_v39 = vsel %vm249_vm2, %v255_v33, %v257_v38  ;;  %v260_v40 = vsel %vm249_vm2, %v257_v38, %v259_v16  ;;  %v1349_v48 = vld [vmem:[%s1420_s23 + $0x3c] sm:$0xff]   ;;  %v1350_v49 = vld [vmem:[%s1420_s23 + $0x44] sm:$0xff]   ;;  %v1351_v50 = vld [vmem:[%s1420_s23 + $0x4c] sm:$0xff]  }
  0x17   : > { %v1068_v46 = vcombine.low %v176_v44, %v1426_v6  ;;  %v1352_v51 = vld [vmem:[%s1420_s23 + $0x54] sm:$0xff]   ;;  %v1354_v52 = vld [vmem:[%s1420_s23 + $0x5c] sm:$0xff]   ;;  %v1355_v54 = vld [vmem:[%s1420_s23 + $0x64] ss:$0 sps:$4 sm:$0x11]  }
  0x18   : > { %1188 = vmatmul.mubr.msk.bf16.vlgmr.msra.gmra.mxu0 %vm282_vm3, %v252_v20  ;;  %1208 = vmatmul.mubr.msk.bf16.vlgmr.msra.gmra.mxu1 %vm282_vm3, %v262_v21  ;;  %v1353_v53 = vld [vmem:[%s1420_s23 + $0x40] ss:$0 sps:$4 sm:$0x11]  }
  0x19   : > { %1266 = vmatpush3.bf16.msra.mxu0 %v692_v18  ;;  %1191 = vmatprep.mubr.msk.bf16.mxu0 %vm1365_vm1, %v1364_v1  ;;  %v1601_v33 = vld [vmem:[%s1677_s2] ss:$0 sm:$0xff] }
  0x1a   : > { %1211 = vmatprep.mubr.msk.bf16.mxu1 %vm1365_vm1, %v1364_v1  ;;  %1224 = vmatpush3.bf16.msra.mxu1 %v477_v22 }
  0x1b   : > { %1267 = vmatprep.subr.bf16.mxu0 %v1364_v1  ;;  %1225 = vmatprep.subr.bf16.mxu1 %v1364_v1 }
  0x1d   : > { %1268 = vmatpush3.bf16.msra.mxu0 %v1336_v24 }
  0x1e   : > { %1269 = vmatprep.subr.bf16.mxu0 %v1364_v1  ;;  %1226 = vmatpush3.bf16.msra.mxu1 %v1339_v26 }
  0x1f   : > { %1227 = vmatprep.subr.bf16.mxu1 %v1364_v1 }
  0x20   : > { %1192 = vmatmul.mubr.msk.bf16.gmra.mxu0 %vm282_vm3, %v254_v28  ;;  %1212 = vmatmul.mubr.msk.bf16.gmra.mxu1 %vm282_vm3, %v264_v30 }
  0x21   : > { %1195 = vmatprep.mubr.msk.bf16.mxu0 %vm1365_vm1, %v1364_v1  ;;  %1215 = vmatprep.mubr.msk.bf16.mxu1 %vm1365_vm1, %v1364_v1 }
  0x22   : > { %1270 = vmatpush3.bf16.msra.mxu0 %v1341_v31  ;;  %1228 = vmatpush3.bf16.msra.mxu1 %v1342_v32 }
  0x28   : > { %1196 = vmatmul.mubr.msk.bf16.gmra.mxu0 %vm282_vm3, %v256_v35  ;;  %1216 = vmatmul.mubr.msk.bf16.gmra.mxu1 %vm282_vm3, %v266_v37 }
  0x29   : > { %1199 = vmatprep.mubr.msk.bf16.mxu0 %vm1365_vm1, %v1364_v1  ;;  %1219 = vmatprep.mubr.msk.bf16.mxu1 %vm1365_vm1, %v1364_v1 }
  0x30   : > { %1200 = vmatmul.mubr.msk.bf16.gmra.mxu0 %vm282_vm3, %v258_v39  ;;  %1220 = vmatmul.mubr.msk.bf16.gmra.mxu1 %vm282_vm3, %v265_v34 }
  0x31   : > { %1203 = vmatprep.mubr.msk.bf16.mxu0 %vm1365_vm1, %v1364_v1  ;;  %1229 = vmatprep.mubr.msk.bf16.mxu1 %vm1365_vm1, %v1364_v1 }
  0x38   : > { %1204 = vmatmul.mubr.msk.bf16.gmra.mxu0 %vm282_vm3, %v260_v40  ;;  %1230 = vmatmul.mubr.msk.bf16.vlgmr.msra.gmra.mxu1 %vm282_vm3, %v1343_v41 }
  0x39   : > { %1271 = vmatprep.mubr.msk.bf16.mxu0 %vm1365_vm1, %v1364_v1  ;;  %1233 = vmatprep.mubr.msk.bf16.mxu1 %vm1365_vm1, %v1364_v1 }
  0x40   : > { %1272 = vmatmul.mubr.msk.bf16.vlgmr.msra.gmra.mxu0 %vm282_vm3, %v1345_v42  ;;  %1234 = vmatmul.mubr.msk.bf16.gmra.mxu1 %vm282_vm3, %v1344_v43 }
  0x41   : > { %1275 = vmatprep.mubr.msk.bf16.mxu0 %vm1365_vm1, %v1364_v1  ;;  %1237 = vmatprep.mubr.msk.bf16.mxu1 %vm1365_vm1, %v1364_v1 }
  0x48   : > { %1276 = vmatmul.mubr.msk.bf16.gmra.mxu0 %vm282_vm3, %v1347_v45  ;;  %1238 = vmatmul.mubr.msk.bf16.gmra.mxu1 %vm282_vm3, %v1068_v46 }
  0x49   : > { %1279 = vmatprep.mubr.msk.bf16.mxu0 %vm1365_vm1, %v1364_v1  ;;  %1241 = vmatprep.mubr.msk.bf16.mxu1 %vm1365_vm1, %v1364_v1 }
  0x50   : > { %1280 = vmatmul.mubr.msk.bf16.gmra.mxu0 %vm282_vm3, %v1348_v47  ;;  %1242 = vmatmul.mubr.msk.bf16.gmra.mxu1 %vm282_vm3, %v1430_v8 }
  0x51   : > { %1283 = vmatprep.mubr.msk.bf16.mxu0 %vm1365_vm1, %v1364_v1  ;;  %1245 = vmatprep.mubr.msk.bf16.mxu1 %vm1365_vm1, %v1364_v1 }
  0x58   : > { %1284 = vmatmul.mubr.msk.bf16.gmra.mxu0 %vm282_vm3, %v1349_v48  ;;  %1246 = vmatmul.mubr.msk.bf16.gmra.mxu1 %vm282_vm3, %v1444_v15 }
  0x59   : > { %1287 = vmatprep.mubr.msk.bf16.mxu0 %vm1365_vm1, %v1364_v1  ;;  %1249 = vmatprep.mubr.msk.bf16.mxu1 %vm1365_vm1, %v1364_v1 }
  0x60   : > { %1288 = vmatmul.mubr.msk.bf16.gmra.mxu0 %vm282_vm3, %v1350_v49  ;;  %1250 = vmatmul.mubr.msk.bf16.gmra.mxu1 %vm282_vm3, %v1337_v29 }
  0x61   : > { %1291 = vmatprep.mubr.msk.bf16.mxu0 %vm1365_vm1, %v1364_v1  ;;  %1253 = vmatprep.mubr.msk.bf16.mxu1 %vm1365_vm1, %v1364_v1 }
  0x68   : > { %1292 = vmatmul.mubr.msk.bf16.gmra.mxu0 %vm282_vm3, %v1351_v50  ;;  %1254 = vmatmul.mubr.msk.bf16.gmra.mxu1 %vm282_vm3, %v1340_v36 }
  0x69   : > { %1295 = vmatprep.mubr.msk.bf16.mxu0 %vm1365_vm1, %v1364_v1  ;;  %1257 = vmatprep.mubr.msk.bf16.mxu1 %vm1365_vm1, %v1364_v1 }
  0x70   : > { %1296 = vmatmul.mubr.msk.bf16.gmra.mxu0 %vm282_vm3, %v1352_v51  ;;  %1258 = vmatmul.mubr.msk.bf16.gmra.mxu1 %vm282_vm3, %v1440_v12 }
  0x71   : > { %1299 = vmatprep.mubr.msk.bf16.mxu0 %vm1365_vm1, %v1364_v1  ;;  %1261 = vmatprep.mubr.msk.bf16.mxu1 %vm1365_vm1, %v1364_v1 }
  0x78   : > { %1300 = vmatmul.mubr.msk.bf16.gmra.mxu0 %vm282_vm3, %v1354_v52  ;;  %1262 = vmatmul.mubr.msk.bf16.gmra.mxu1 %vm282_vm3, %v1353_v53 }
  0x79   : > { %1303 = vmatprep.mubr.msk.bf16.mxu0 %vm1365_vm1, %v1364_v1 }
  0x80   : > { %1304 = vmatmul.mubr.msk.bf16.gmra.mxu0 %vm282_vm3, %v1355_v54 }
  0xd8   : > { %v348_v55 = vpop.f32.mrf.mxu0  ;;  %v1572_v56 = vpop.f32.mrf.mxu1 }
  0xda   : > { %v1189_v57 = vpop.f32.mrf.mxu0  ;;  %v1209_v58 = vpop.f32.mrf.mxu1 }
  0xdc   : > { %v351_v59 = vpop.f32.mrf.mxu0  ;;  %v1574_v60 = vpop.f32.mrf.mxu1 }
  0xde   : > { %v1190_v61 = vpop.f32.mrf.mxu0  ;;  %v1210_v62 = vpop.f32.mrf.mxu1 }
  0xe0   : > { %v356_v63 = vpop.f32.mrf.mxu0  ;;  %v1576_v0 = vpop.f32.mrf.mxu1 }
  0xe2   : > { %v1193_v2 = vpop.f32.mrf.mxu0  ;;  %v1213_v3 = vpop.f32.mrf.mxu1 }
  0xe4   : > { %v359_v4 = vpop.f32.mrf.mxu0  ;;  %v1578_v1 = vpop.f32.mrf.mxu1 }
  0xe6   : > { %v1194_v5 = vpop.f32.mrf.mxu0  ;;  %v1214_v6 = vpop.f32.mrf.mxu1 }
  0xe8   : > { %v1580_v7 = vpop.f32.mrf.mxu0  ;;  %v1582_v8 = vpop.f32.mrf.mxu1 }
  0xea   : > { %v1197_v9 = vpop.f32.mrf.mxu0  ;;  %v1217_v10 = vpop.f32.mrf.mxu1 }
  0xec   : > { %v1584_v11 = vpop.f32.mrf.mxu0  ;;  %v1586_v12 = vpop.f32.mrf.mxu1 }
  0xee   : > { %v1198_v13 = vpop.f32.mrf.mxu0  ;;  %v1218_v14 = vpop.f32.mrf.mxu1 }
  0xf0   : > { %v1588_v15 = vpop.f32.mrf.mxu0  ;;  %v1590_v16 = vpop.f32.mrf.mxu1 }
  0xf2   : > { %v1201_v17 = vpop.f32.mrf.mxu0  ;;  %v1221_v18 = vpop.f32.mrf.mxu1 }
  0xf4   : > { %v1592_v19 = vpop.f32.mrf.mxu0  ;;  %v415_v20 = vpop.f32.mrf.mxu1 }
  0xf6   : > { %v1202_v21 = vpop.f32.mrf.mxu0  ;;  %v1222_v22 = vpop.f32.mrf.mxu1 }
  0xf8   : > { %v1594_v23 = vpop.f32.mrf.mxu0  ;;  %v513_v24 = vpop.f32.mrf.mxu1 }
  0xf9   : > { %v514_v30 = vadd.f32 %v513_v24, %v348_v55 }
  0xfa   : > { %v1205_v25 = vpop.f32.mrf.mxu0  ;;  %v1231_v26 = vpop.f32.mrf.mxu1 }
  0xfc   : > { %v1596_v27 = vpop.f32.mrf.mxu0  ;;  %v516_v28 = vpop.f32.mrf.mxu1 }
  0xfd   : > { %v517_v37 = vadd.f32 %v516_v28, %v351_v59 }
  0xfe   : > { %v1206_v29 = vpop.f32.mrf.mxu0  ;;  %v1232_v31 = vpop.f32.mrf.mxu1 }
 0x100   : > { %v728_v32 = vpop.f32.mrf.mxu0  ;;  %v521_v34 = vpop.f32.mrf.mxu1 }
 0x101   : > { %v798_v35 = vadd.f32 %v728_v32, %v514_v30  ;;  %v522_v45 = vadd.f32 %v521_v34, %v356_v63 }
 0x102   : > { %v1273_v36 = vpop.f32.mrf.mxu0  ;;  %v1235_v39 = vpop.f32.mrf.mxu1 }
 0x103   : > { %v822_v38 = vadd.f32 %v1601_v33, %v798_v35 }
 0x104   : > { %v731_v40 = vpop.f32.mrf.mxu0  ;;  %v524_v42 = vpop.f32.mrf.mxu1 }
 0x105   : > { %vm839_vm4 = vcmp.ge.f32.partialorder %v822_v38, 0.0  ;;  %v856_v41 = vmul.f32 0.1, %v822_v38  ;;  %v799_v43 = vadd.f32 %v731_v40, %v517_v37  ;;  %v525_v55 = vadd.f32 %v524_v42, %v359_v4 }
 0x106   : > { %v1274_v44 = vpop.f32.mrf.mxu0  ;;  %v1236_v48 = vpop.f32.mrf.mxu1 }
 0x107   : > { %v873_v46 = vsel %vm839_vm4, %v822_v38, %v856_v41  ;;  %v823_v47 = vadd.f32 %v1601_v33, %v799_v43 }
 0x108   : > { %v1128_v49 = vpack.c.bf16 %v873_v46, %v873_v46  ;;  %v736_v50 = vpop.f32.mrf.mxu0  ;;  %v529_v52 = vpop.f32.mrf.mxu1 }
 0x109   : > { %vm840_vm6 = vcmp.ge.f32.partialorder %v823_v47, 0.0  ;;  %v857_v51 = vmul.f32 0.1, %v823_v47  ;;  %v800_v53 = vadd.f32 %v736_v50, %v522_v45  ;;  %v530_v6 = vadd.f32 %v529_v52, %v1580_v7 }
 0x10a   : > { %960 = vst.msk [vmem:[%s1608_s16] sm:$0xf] %vm959_vm5, %v1128_v49  ;;  %v1277_v54 = vpop.f32.mrf.mxu0  ;;  %v1239_v59 = vpop.f32.mrf.mxu1 }
 0x10b   : > { %v874_v57 = vsel %vm840_vm6, %v823_v47, %v857_v51  ;;  %v824_v58 = vadd.f32 %v1601_v33, %v800_v53 }
 0x10c   : > { %v1129_v61 = vpack.c.bf16 %v874_v57, %v874_v57  ;;  %v739_v62 = vpop.f32.mrf.mxu0  ;;  %v532_v2 = vpop.f32.mrf.mxu1 }
 0x10d   : > { %vm841_vm7 = vcmp.ge.f32.partialorder %v824_v58, 0.0  ;;  %v858_v63 = vmul.f32 0.1, %v824_v58  ;;  %v801_v3 = vadd.f32 %v739_v62, %v525_v55  ;;  %v533_v22 = vadd.f32 %v532_v2, %v1584_v11 }
 0x10e   : > { %961 = vst.msk [vmem:[%s1608_s16 + $0x4] sm:$0xf] %vm959_vm5, %v1129_v61  ;;  %v1278_v5 = vpop.f32.mrf.mxu0  ;;  %v1240_v4 = vpop.f32.mrf.mxu1 }
 0x10f   : > { %v875_v9 = vsel %vm841_vm7, %v824_v58, %v858_v63  ;;  %v825_v10 = vadd.f32 %v1601_v33, %v801_v3  ;;  %vm976_vm7 = vcmask 24576  }
 0x110   : > { %v1130_v13 = vpack.c.bf16 %v875_v9, %v875_v9  ;;  %v744_v14 = vpop.f32.mrf.mxu0  ;;  %v537_v18 = vpop.f32.mrf.mxu1 }
 0x111   : > { %vm842_vm8 = vcmp.ge.f32.partialorder %v825_v10, 0.0  ;;  %v859_v17 = vmul.f32 0.1, %v825_v10  ;;  %v802_v20 = vadd.f32 %v744_v14, %v530_v6  ;;  %v538_v34 = vadd.f32 %v537_v18, %v1588_v15 }
 0x112   : > { %962 = vst.msk [vmem:[%s1608_s16 + $0x8] sm:$0xf] %vm959_vm5, %v1130_v13  ;;  %v1281_v21 = vpop.f32.mrf.mxu0  ;;  %v1243_v7 = vpop.f32.mrf.mxu1 }
 0x113   : > { %v876_v24 = vsel %vm842_vm8, %v825_v10, %v859_v17  ;;  %v826_v25 = vadd.f32 %v1601_v33, %v802_v20 }
 0x114   : > { %v1131_v26 = vpack.c.bf16 %v876_v24, %v876_v24  ;;  %v747_v28 = vpop.f32.mrf.mxu0  ;;  %v540_v30 = vpop.f32.mrf.mxu1 }
 0x115   : > { %vm843_vm9 = vcmp.ge.f32.partialorder %v826_v25, 0.0  ;;  %v860_v29 = vmul.f32 0.1, %v826_v25  ;;  %v803_v31 = vadd.f32 %v747_v28, %v533_v22  ;;  %v541_v43 = vadd.f32 %v540_v30, %v1592_v19 }
 0x116   : > { %963 = vst.msk [vmem:[%s1608_s16 + $0xc] sm:$0xf] %vm959_vm5, %v1131_v26  ;;  %v1282_v32 = vpop.f32.mrf.mxu0  ;;  %v1244_v11 = vpop.f32.mrf.mxu1 }
 0x117   : > { %v877_v35 = vsel %vm843_vm9, %v826_v25, %v860_v29  ;;  %v827_v36 = vadd.f32 %v1601_v33, %v803_v31 }
 0x118   : > { %v1132_v37 = vpack.c.bf16 %v877_v35, %v877_v35  ;;  %v752_v38 = vpop.f32.mrf.mxu0  ;;  %v545_v40 = vpop.f32.mrf.mxu1 }
 0x119   : > { %vm844_vm10 = vcmp.ge.f32.partialorder %v827_v36, 0.0  ;;  %v861_v39 = vmul.f32 0.1, %v827_v36  ;;  %v804_v41 = vadd.f32 %v752_v38, %v538_v34  ;;  %v546_v52 = vadd.f32 %v545_v40, %v1594_v23 }
 0x11a   : > { %964 = vst.msk [vmem:[%s1608_s16 + $0x10] sm:$0xf] %vm959_vm5, %v1132_v37  ;;  %v1285_v42 = vpop.f32.mrf.mxu0  ;;  %v1247_v15 = vpop.f32.mrf.mxu1 }
 0x11b   : > { %v878_v44 = vsel %vm844_vm10, %v827_v36, %v861_v39  ;;  %v828_v45 = vadd.f32 %v1601_v33, %v804_v41 }
 0x11c   : > { %v1133_v46 = vpack.c.bf16 %v878_v44, %v878_v44  ;;  %v755_v47 = vpop.f32.mrf.mxu0  ;;  %v548_v49 = vpop.f32.mrf.mxu1 }
 0x11d   : > { %vm845_vm11 = vcmp.ge.f32.partialorder %v828_v45, 0.0  ;;  %v862_v48 = vmul.f32 0.1, %v828_v45  ;;  %v805_v50 = vadd.f32 %v755_v47, %v541_v43  ;;  %v549_v63 = vadd.f32 %v548_v49, %v1596_v27 }
 0x11e   : > { %965 = vst.msk [vmem:[%s1608_s16 + $0x14] sm:$0xf] %vm959_vm5, %v1133_v46  ;;  %v1286_v51 = vpop.f32.mrf.mxu0  ;;  %v1248_v19 = vpop.f32.mrf.mxu1 }
 0x11f   : > { %v879_v53 = vsel %vm845_vm11, %v828_v45, %v862_v48  ;;  %v829_v54 = vadd.f32 %v1601_v33, %v805_v50 }
 0x120   : > { %v1134_v55 = vpack.c.bf16 %v879_v53, %v879_v53  ;;  %v760_v57 = vpop.f32.mrf.mxu0  ;;  %v553_v59 = vpop.f32.mrf.mxu1 }
 0x121   : > { %vm846_vm12 = vcmp.ge.f32.partialorder %v829_v54, 0.0  ;;  %v863_v58 = vmul.f32 0.1, %v829_v54  ;;  %v806_v61 = vadd.f32 %v760_v57, %v546_v52  ;;  %v554_v14 = vadd.f32 %v553_v59, %v1572_v56 }
 0x122   : > { %966 = vst.msk [vmem:[%s1608_s16 + $0x18] sm:$0xf] %vm959_vm5, %v1134_v55  ;;  %v1289_v62 = vpop.f32.mrf.mxu0  ;;  %v1251_v23 = vpop.f32.mrf.mxu1 }
 0x123   : > { %v880_v2 = vsel %vm846_vm12, %v829_v54, %v863_v58  ;;  %v830_v3 = vadd.f32 %v1601_v33, %v806_v61 }
 0x124   : > { %v1135_v5 = vpack.c.bf16 %v880_v2, %v880_v2  ;;  %v763_v6 = vpop.f32.mrf.mxu0  ;;  %v556_v10 = vpop.f32.mrf.mxu1 }
 0x125   : > { %vm847_vm13 = vcmp.ge.f32.partialorder %v830_v3, 0.0  ;;  %v864_v9 = vmul.f32 0.1, %v830_v3  ;;  %v807_v4 = vadd.f32 %v763_v6, %v549_v63  ;;  %v557_v26 = vadd.f32 %v556_v10, %v1574_v60 }
 0x126   : > { %967 = vst.msk [vmem:[%s1608_s16 + $0x1c] sm:$0xf] %vm959_vm5, %v1135_v5  ;;  %v1290_v13 = vpop.f32.mrf.mxu0  ;;  %v1252_v27 = vpop.f32.mrf.mxu1 }
 0x127   : > { %v881_v17 = vsel %vm847_vm13, %v830_v3, %v864_v9  ;;  %v831_v18 = vadd.f32 %v1601_v33, %v807_v4 }
 0x128   : > { %v1136_v20 = vpack.c.bf16 %v881_v17, %v881_v17  ;;  %v768_v21 = vpop.f32.mrf.mxu0  ;;  %v561_v24 = vpop.f32.mrf.mxu1 }
 0x129   : > { %vm848_vm14 = vcmp.ge.f32.partialorder %v831_v18, 0.0  ;;  %v865_v22 = vmul.f32 0.1, %v831_v18  ;;  %v808_v25 = vadd.f32 %v768_v21, %v554_v14  ;;  %v562_v11 = vadd.f32 %v561_v24, %v1576_v0 }
 0x12a   : > { %968 = vst.msk [vmem:[%s1608_s16 + $0x20] sm:$0xf] %vm959_vm5, %v1136_v20  ;;  %v1293_v7 = vpop.f32.mrf.mxu0  ;;  %v1255_v56 = vpop.f32.mrf.mxu1 }
 0x12b   : > { %v882_v28 = vsel %vm848_vm14, %v831_v18, %v865_v22  ;;  %v832_v29 = vadd.f32 %v1601_v33, %v808_v25 }
 0x12c   : > { %v1137_v30 = vpack.c.bf16 %v882_v28, %v882_v28  ;;  %v771_v31 = vpop.f32.mrf.mxu0  ;;  %v564_v34 = vpop.f32.mrf.mxu1 }
 0x12d   : > { %vm849_vm15 = vcmp.ge.f32.partialorder %v832_v29, 0.0  ;;  %v866_v32 = vmul.f32 0.1, %v832_v29  ;;  %v809_v35 = vadd.f32 %v771_v31, %v557_v26  ;;  %v565_v45 = vadd.f32 %v564_v34, %v1578_v1 }
 0x12e   : > { %969 = vst.msk [vmem:[%s1608_s16 + $0x24] sm:$0xf] %vm959_vm5, %v1137_v30  ;;  %v1294_v36 = vpop.f32.mrf.mxu0  ;;  %v1256_v60 = vpop.f32.mrf.mxu1 }
 0x12f   : > { %v883_v37 = vsel %vm849_vm15, %v832_v29, %v866_v32  ;;  %v833_v38 = vadd.f32 %v1601_v33, %v809_v35 }
 0x130   : > { %v1138_v39 = vpack.c.bf16 %v883_v37, %v883_v37  ;;  %v776_v40 = vpop.f32.mrf.mxu0  ;;  %v569_v42 = vpop.f32.mrf.mxu1 }
 0x131   : > { %vm850_vm0 = vcmp.ge.f32.partialorder %v833_v38, 0.0  ;;  %v867_v41 = vmul.f32 0.1, %v833_v38  ;;  %v810_v43 = vadd.f32 %v776_v40, %v562_v11  ;;  %v570_v53 = vadd.f32 %v569_v42, %v1582_v8 }
 0x132   : > { %970 = vst.msk [vmem:[%s1608_s16 + $0x28] sm:$0xf] %vm959_vm5, %v1138_v39  ;;  %v1297_v44 = vpop.f32.mrf.mxu0  ;;  %v1259_v0 = vpop.f32.mrf.mxu1 }
 0x133   : > { %v884_v15 = vsel %vm850_vm0, %v833_v38, %v867_v41  ;;  %v834_v46 = vadd.f32 %v1601_v33, %v810_v43 }
 0x134   : > { %v1139_v47 = vpack.c.bf16 %v884_v15, %v884_v15  ;;  %v779_v48 = vpop.f32.mrf.mxu0  ;;  %v572_v50 = vpop.f32.mrf.mxu1 }
 0x135   : > { %vm851_vm1 = vcmp.ge.f32.partialorder %v834_v46, 0.0  ;;  %v868_v49 = vmul.f32 0.1, %v834_v46  ;;  %v811_v51 = vadd.f32 %v779_v48, %v565_v45  ;;  %v573_v63 = vadd.f32 %v572_v50, %v1586_v12 }
 0x136   : > { %971 = vst.msk [vmem:[%s1608_s16 + $0x2c] sm:$0xf] %vm959_vm5, %v1139_v47  ;;  %v1298_v52 = vpop.f32.mrf.mxu0  ;;  %v1260_v1 = vpop.f32.mrf.mxu1 }
 0x137   : > { %v885_v54 = vsel %vm851_vm1, %v834_v46, %v868_v49  ;;  %v835_v19 = vadd.f32 %v1601_v33, %v811_v51 }
 0x138   : > { %v1140_v55 = vpack.c.bf16 %v885_v54, %v885_v54  ;;  %v784_v57 = vpop.f32.mrf.mxu0  ;;  %v577_v59 = vpop.f32.mrf.mxu1 }
 0x139   : > { %vm852_vm2 = vcmp.ge.f32.partialorder %v835_v19, 0.0  ;;  %v869_v58 = vmul.f32 0.1, %v835_v19  ;;  %v812_v61 = vadd.f32 %v784_v57, %v570_v53  ;;  %v578_v13 = vadd.f32 %v577_v59, %v1590_v16 }
 0x13a   : > { %972 = vst.msk [vmem:[%s1608_s16 + $0x30] sm:$0xf] %vm959_vm5, %v1140_v55  ;;  %v1301_v62 = vpop.f32.mrf.mxu0  ;;  %v1263_v8 = vpop.f32.mrf.mxu1 }
 0x13b   : > { %v886_v2 = vsel %vm852_vm2, %v835_v19, %v869_v58  ;;  %v836_v3 = vadd.f32 %v1601_v33, %v812_v61 }
 0x13c   : > { %v1141_v23 = vpack.c.bf16 %v886_v2, %v886_v2  ;;  %v787_v5 = vpop.f32.mrf.mxu0  ;;  %v580_v10 = vpop.f32.mrf.mxu1 }
 0x13d   : > { %vm853_vm3 = vcmp.ge.f32.partialorder %v836_v3, 0.0  ;;  %v870_v6 = vmul.f32 0.1, %v836_v3  ;;  %v813_v9 = vadd.f32 %v787_v5, %v573_v63 }
 0x13e   : > { %973 = vst.msk [vmem:[%s1608_s16 + $0x34] sm:$0xf] %vm959_vm5, %v1141_v23  ;;  %v1302_v4 = vpop.f32.mrf.mxu0  ;;  %v1264_v17 = vpop.f32.mrf.mxu1 }
 0x13f   : > { %v887_v14 = vsel %vm853_vm3, %v836_v3, %v870_v6  ;;  %v837_v12 = vadd.f32 %v1601_v33, %v813_v9 }
 0x140   : > { %v1142_v18 = vpack.c.bf16 %v887_v14, %v887_v14  ;;  %v792_v27 = vpop.f32.mrf.mxu0 }
 0x141   : > { %vm854_vm4 = vcmp.ge.f32.partialorder %v837_v12, 0.0  ;;  %v871_v20 = vmul.f32 0.1, %v837_v12  ;;  %v814_v21 = vadd.f32 %v792_v27, %v578_v13 }
 0x142   : > { %974 = vst.msk [vmem:[%s1608_s16 + $0x38] sm:$0xf] %vm959_vm5, %v1142_v18  ;;  %v1305_v22 = vpop.f32.mrf.mxu0 }
 0x143   : > { %v888_v24 = vsel %vm854_vm4, %v837_v12, %v871_v20  ;;  %v838_v25 = vadd.f32 %v1601_v33, %v814_v21 }
 0x144   : > { %v1143_v7 = vpack.c.bf16 %v888_v24, %v888_v24  ;;  %v795_v26 = vpop.f32.mrf.mxu0 }
 0x145   : > { %vm855_vm6 = vcmp.ge.f32.partialorder %v838_v25, 0.0  ;;  %v872_v16 = vmul.f32 0.1, %v838_v25 }
 0x146   : > { %975 = vst.msk [vmem:[%s1608_s16 + $0x3c] sm:$0xf] %vm959_vm5, %v1143_v7  ;;  %v1306_v28 = vpop.f32.mrf.mxu0 }
 0x147   : > { %v889_v29 = vsel %vm855_vm6, %v838_v25, %v872_v16 }
 0x148   : > { %v1144_v56 = vpack.c.bf16 %v889_v29, %v889_v29 }
 0x14a   : > { %977 = vst.msk [vmem:[%s1608_s16 + $0x40] sm:$0x1] %vm976_vm7, %v1144_v56 }
 0x14b PF: > { %s13_s12 = sadd.s32 1, %s1362_s12  }
 0x14c   : > { %p10_p4 = scmp.ge.s32.totalorder %s13_s12, 4  }
 0x14e   :  { %12 = sbr.rel (!%p10_p4) target bundleno = 1 (0x1), region = 64 }

// kernel: downconv3d_forward.3
= control target key start
LH: loop header
LB: loop body
LE: loop exit
PB: predicated region body
PF: predicated region fallthrough
CT: control target
= control target key end

     0   :  { %s1283_s12 = smov 0   ;;  %s1572_s0 = inlined_call_operand.vmem [shape: bf16[2,216,36], index: 0, kind: input, shape index: {}]   ;;  %s1573_s1 = inlined_call_operand.vmem [shape: bf16[3,36,128], index: 1, kind: input, shape index: {}]   ;;  %s1574_s2 = inlined_call_operand.vmem [shape: f32[1,128], index: 2, kind: input, shape index: {}]   ;;  %s1575_s3 = inlined_call_operand.vmem [shape: f32[2,144,8], index: 3, kind: output, shape index: {}]  }
   0x1 LB: > { %s964_s13 = sadd.s32 4294967295, %s1259_s12   ;;  %p968_p0 = scmp.ge.s32.totalorder %s1259_s12, 1  ;;  %s1259_s12 = sphi %s1283_s12, %s13_s12  }
   0x2   : > { %p137_p1 = scmp.lt.s32.totalorder %s1259_s12, 3 }
   0x4   : > { %p138_p2 = pnand %p968_p0, %p137_p1 }
   0x5   : > { %p161_p3 = scmp.lt.s32.totalorder (!%p138_p2), %s964_s13, 1 }
   0x6   : > { %141 = sbr.rel (%p138_p2) target bundleno = 329 (0x149), region = 32 }
   0xb   : > { %v1222_v0 = vld [vmem:[%s1573_s1 + $0x24] ss:$0 sps:$4 sm:$0x33]   ;;  %v1261_v1 = vmov 0.0   ;;  %vm310_vm0 = vcmask 1041408   ;;  %v1223_v3 = vld [vmem:[%s1573_s1 + $0x1c] sm:$0xff]  }
   0xc   : > { %1078 = vmatprep.subr.bf16.mxu0 %v1261_v1  ;;  %1204 = vmatprep.subr.bf16.mxu1 %v1261_v1  ;;  %v312_v2 = vsel %vm310_vm0, %v1222_v0, 0  ;;  %vm1262_vm1 = vmmov 0   ;;  %s1577_s13 = smov (!%p161_p3, %s964_s13), 1  ;;  %v1224_v4 = vld [vmem:[%s1573_s1 + $0x14] sm:$0xff]   ;;  %vm249_vm2 = vcmask 1045504   ;;  %vm282_vm3 = vcmask 293888  }
   0xd   : > { %1079 = vmatpush3.bf16.msra.mxu0 %v312_v2  ;;  %1207 = vmatpush3.bf16.msra.mxu1 %v312_v2  ;;  %s1210_s20 = smul.u32 108, %s1577_s13  ;;  %v1229_v5 = vld [vmem:[%s1573_s1 + $0x38] ss:$0 sps:$4 sm:$0x33]   ;;  %v1233_v24 = vld [vmem:[%s1573_s1 + $0x30] sm:$0xff]   ;;  %v1236_v26 = vld [vmem:[%s1573_s1 + $0x8] sm:$0xff]  }
   0xe   : > { %1080 = vmatprep.subr.bf16.mxu0 %v1261_v1  ;;  %1205 = vmatprep.subr.bf16.mxu1 %v1261_v1  ;;  %v1230_v9 = vld [vmem:[%s1573_s1 + $0x10] ss:$0 sps:$4 sm:$0x33]   ;;  %v692_v18 = vsel %vm310_vm0, %v1229_v5, 0  ;;  %v1238_v31 = vld [vmem:[%s1573_s1 + $0x28] sm:$0xff]   ;;  %v1239_v32 = vld [vmem:[%s1573_s1] sm:$0xff]  }
   0xf   : > { %1084 = vmatprep.mubr.msk.bf16.mxu0 %vm1262_vm1, %v1261_v1  ;;  %1104 = vmatprep.mubr.msk.bf16.mxu1 %vm1262_vm1, %v1261_v1  ;;  %s1317_s23 = scalar_lea.vmem %s1572_s0, %s1210_s20  ;;  %v477_v22 = vsel %vm310_vm0, %v1230_v9, 0  ;;  %s1211_s11 = smul.u32 144, %s1577_s13  ;;  %vm890_vm5 = vcmask 64512  }
  0x10   : > { %v1323_v6 = vld [vmem:[%s1317_s23 + $0x14] sm:$0xf]  ;;  %v194_v7 = vld [vmem:[%s1317_s23 + $0x10] sm:$0xc]  ;;  %v1327_v8 = vld [vmem:[%s1317_s23 + $0x18] sm:$0xff]  }
  0x11   : > { %1081 = vmatpush3.bf16.msra.mxu0 %v1223_v3  ;;  %1208 = vmatpush3.bf16.msra.mxu1 %v1223_v3  ;;  %v976_v10 = vcombine.low %v194_v7, %v1323_v6  ;;  %v251_v11 = vrot.slane %v1327_v8, 2  ;;  %v1337_v12 = vld [vmem:[%s1317_s23 + $0x38] sm:$0xff]   ;;  %v1228_v13 = vld [vmem:[%s1317_s23 + $0x40] sm:$0xff]   ;;  %v1232_v19 = vld [vmem:[%s1317_s23 + $0x48] sm:$0xff]   ;;  %s1505_s16 = scalar_lea.vmem %s1575_s3, %s1211_s11 }
  0x12   : > { %1082 = vmatprep.subr.bf16.mxu0 %v1261_v1  ;;  %1206 = vmatprep.subr.bf16.mxu1 %v1261_v1  ;;  %v1341_v15 = vld [vmem:[%s1317_s23 + $0x20] sm:$0xff]   ;;  %v259_v16 = vrot.slane %v1337_v12, 2  ;;  %v261_v17 = vrot.slane %v1228_v13, 2  ;;  %v263_v25 = vrot.slane %v1232_v19, 2  ;;  %v1234_v29 = vld [vmem:[%s1317_s23 + $0x28] sm:$0xff]   ;;  %v1237_v36 = vld [vmem:[%s1317_s23 + $0x30] sm:$0xff]  }
  0x13   : > { %v250_v14 = vrot.slane %v976_v10, 2  ;;  %v253_v23 = vrot.slane %v1341_v15, 2  ;;  %v1235_v27 = vld [vmem:[%s1317_s23 + $0x50] ss:$0 sps:$4 sm:$0x77]   ;;  %v255_v33 = vrot.slane %v1234_v29, 2 }
  0x14   : > { %v262_v21 = vsel %vm249_vm2, %v259_v16, %v261_v17  ;;  %v264_v30 = vsel %vm249_vm2, %v261_v17, %v263_v25  ;;  %v265_v34 = vrot.slane %v1235_v27, 2  ;;  %v257_v38 = vrot.slane %v1237_v36, 2  ;;  %v1240_v41 = vld [vmem:[%s1317_s23] sm:$0xff]   ;;  %v1241_v43 = vld [vmem:[%s1317_s23 + $0x8] sm:$0xff]   ;;  %v176_v44 = vld [vmem:[%s1317_s23 + $0x10] sm:$0xf] }
  0x15   : > { %1083 = vmatpush3.bf16.msra.mxu0 %v1224_v4  ;;  %1209 = vmatpush3.bf16.msra.mxu1 %v1224_v4  ;;  %v252_v20 = vsel %vm249_vm2, %v250_v14, %v251_v11  ;;  %v254_v28 = vsel %vm249_vm2, %v251_v11, %v253_v23  ;;  %v256_v35 = vsel %vm249_vm2, %v253_v23, %v255_v33  ;;  %v1242_v42 = vld [vmem:[%s1317_s23 + $0x24] sm:$0xff]   ;;  %v1244_v45 = vld [vmem:[%s1317_s23 + $0x2c] sm:$0xff]   ;;  %v1245_v47 = vld [vmem:[%s1317_s23 + $0x34] sm:$0xff]  }
  0x16   : > { %1162 = vmatprep.subr.bf16.mxu0 %v1261_v1  ;;  %1120 = vmatprep.subr.bf16.mxu1 %v1261_v1  ;;  %v266_v37 = vsel %vm249_vm2, %v263_v25, %v265_v34  ;;  %v258_v39 = vsel %vm249_vm2, %v255_v33, %v257_v38  ;;  %v260_v40 = vsel %vm249_vm2, %v257_v38, %v259_v16  ;;  %v1246_v48 = vld [vmem:[%s1317_s23 + $0x3c] sm:$0xff]   ;;  %v1247_v49 = vld [vmem:[%s1317_s23 + $0x44] sm:$0xff]   ;;  %v1248_v50 = vld [vmem:[%s1317_s23 + $0x4c] sm:$0xff]  }
  0x17   : > { %v999_v46 = vcombine.low %v176_v44, %v1323_v6  ;;  %v1249_v51 = vld [vmem:[%s1317_s23 + $0x54] sm:$0xff]   ;;  %v1251_v52 = vld [vmem:[%s1317_s23 + $0x5c] sm:$0xff]   ;;  %v1252_v54 = vld [vmem:[%s1317_s23 + $0x64] ss:$0 sps:$4 sm:$0x11]  }
  0x18   : > { %1085 = vmatmul.mubr.msk.bf16.vlgmr.msra.gmra.mxu0 %vm282_vm3, %v252_v20  ;;  %1105 = vmatmul.mubr.msk.bf16.vlgmr.msra.gmra.mxu1 %vm282_vm3, %v262_v21  ;;  %v1250_v53 = vld [vmem:[%s1317_s23 + $0x40] ss:$0 sps:$4 sm:$0x11]  }
  0x19   : > { %1163 = vmatpush3.bf16.msra.mxu0 %v692_v18  ;;  %1088 = vmatprep.mubr.msk.bf16.mxu0 %vm1262_vm1, %v1261_v1  ;;  %v1498_v33 = vld [vmem:[%s1574_s2] ss:$0 sm:$0xff] }
  0x1a   : > { %1108 = vmatprep.mubr.msk.bf16.mxu1 %vm1262_vm1, %v1261_v1  ;;  %1121 = vmatpush3.bf16.msra.mxu1 %v477_v22 }
  0x1b   : > { %1164 = vmatprep.subr.bf16.mxu0 %v1261_v1  ;;  %1122 = vmatprep.subr.bf16.mxu1 %v1261_v1 }
  0x1d   : > { %1165 = vmatpush3.bf16.msra.mxu0 %v1233_v24 }
  0x1e   : > { %1166 = vmatprep.subr.bf16.mxu0 %v1261_v1  ;;  %1123 = vmatpush3.bf16.msra.mxu1 %v1236_v26 }
  0x1f   : > { %1124 = vmatprep.subr.bf16.mxu1 %v1261_v1 }
  0x20   : > { %1089 = vmatmul.mubr.msk.bf16.gmra.mxu0 %vm282_vm3, %v254_v28  ;;  %1109 = vmatmul.mubr.msk.bf16.gmra.mxu1 %vm282_vm3, %v264_v30 }
  0x21   : > { %1092 = vmatprep.mubr.msk.bf16.mxu0 %vm1262_vm1, %v1261_v1  ;;  %1112 = vmatprep.mubr.msk.bf16.mxu1 %vm1262_vm1, %v1261_v1 }
  0x22   : > { %1167 = vmatpush3.bf16.msra.mxu0 %v1238_v31  ;;  %1125 = vmatpush3.bf16.msra.mxu1 %v1239_v32 }
  0x28   : > { %1093 = vmatmul.mubr.msk.bf16.gmra.mxu0 %vm282_vm3, %v256_v35  ;;  %1113 = vmatmul.mubr.msk.bf16.gmra.mxu1 %vm282_vm3, %v266_v37 }
  0x29   : > { %1096 = vmatprep.mubr.msk.bf16.mxu0 %vm1262_vm1, %v1261_v1  ;;  %1116 = vmatprep.mubr.msk.bf16.mxu1 %vm1262_vm1, %v1261_v1 }
  0x30   : > { %1097 = vmatmul.mubr.msk.bf16.gmra.mxu0 %vm282_vm3, %v258_v39  ;;  %1117 = vmatmul.mubr.msk.bf16.gmra.mxu1 %vm282_vm3, %v265_v34 }
  0x31   : > { %1100 = vmatprep.mubr.msk.bf16.mxu0 %vm1262_vm1, %v1261_v1  ;;  %1126 = vmatprep.mubr.msk.bf16.mxu1 %vm1262_vm1, %v1261_v1 }
  0x38   : > { %1101 = vmatmul.mubr.msk.bf16.gmra.mxu0 %vm282_vm3, %v260_v40  ;;  %1127 = vmatmul.mubr.msk.bf16.vlgmr.msra.gmra.mxu1 %vm282_vm3, %v1240_v41 }
  0x39   : > { %1168 = vmatprep.mubr.msk.bf16.mxu0 %vm1262_vm1, %v1261_v1  ;;  %1130 = vmatprep.mubr.msk.bf16.mxu1 %vm1262_vm1, %v1261_v1 }
  0x40   : > { %1169 = vmatmul.mubr.msk.bf16.vlgmr.msra.gmra.mxu0 %vm282_vm3, %v1242_v42  ;;  %1131 = vmatmul.mubr.msk.bf16.gmra.mxu1 %vm282_vm3, %v1241_v43 }
  0x41   : > { %1172 = vmatprep.mubr.msk.bf16.mxu0 %vm1262_vm1, %v1261_v1  ;;  %1134 = vmatprep.mubr.msk.bf16.mxu1 %vm1262_vm1, %v1261_v1 }
  0x48   : > { %1173 = vmatmul.mubr.msk.bf16.gmra.mxu0 %vm282_vm3, %v1244_v45  ;;  %1135 = vmatmul.mubr.msk.bf16.gmra.mxu1 %vm282_vm3, %v999_v46 }
  0x49   : > { %1176 = vmatprep.mubr.msk.bf16.mxu0 %vm1262_vm1, %v1261_v1  ;;  %1138 = vmatprep.mubr.msk.bf16.mxu1 %vm1262_vm1, %v1261_v1 }
  0x50   : > { %1177 = vmatmul.mubr.msk.bf16.gmra.mxu0 %vm282_vm3, %v1245_v47  ;;  %1139 = vmatmul.mubr.msk.bf16.gmra.mxu1 %vm282_vm3, %v1327_v8 }
  0x51   : > { %1180 = vmatprep.mubr.msk.bf16.mxu0 %vm1262_vm1, %v1261_v1  ;;  %1142 = vmatprep.mubr.msk.bf16.mxu1 %vm1262_vm1, %v1261_v1 }
  0x58   : > { %1181 = vmatmul.mubr.msk.bf16.gmra.mxu0 %vm282_vm3, %v1246_v48  ;;  %1143 = vmatmul.mubr.msk.bf16.gmra.mxu1 %vm282_vm3, %v1341_v15 }
  0x59   : > { %1184 = vmatprep.mubr.msk.bf16.mxu0 %vm1262_vm1, %v1261_v1  ;;  %1146 = vmatprep.mubr.msk.bf16.mxu1 %vm1262_vm1, %v1261_v1 }
  0x60   : > { %1185 = vmatmul.mubr.msk.bf16.gmra.mxu0 %vm282_vm3, %v1247_v49  ;;  %1147 = vmatmul.mubr.msk.bf16.gmra.mxu1 %vm282_vm3, %v1234_v29 }
  0x61   : > { %1188 = vmatprep.mubr.msk.bf16.mxu0 %vm1262_vm1, %v1261_v1  ;;  %1150 = vmatprep.mubr.msk.bf16.mxu1 %vm1262_vm1, %v1261_v1 }
  0x68   : > { %1189 = vmatmul.mubr.msk.bf16.gmra.mxu0 %vm282_vm3, %v1248_v50  ;;  %1151 = vmatmul.mubr.msk.bf16.gmra.mxu1 %vm282_vm3, %v1237_v36 }
  0x69   : > { %1192 = vmatprep.mubr.msk.bf16.mxu0 %vm1262_vm1, %v1261_v1  ;;  %1154 = vmatprep.mubr.msk.bf16.mxu1 %vm1262_vm1, %v1261_v1 }
  0x70   : > { %1193 = vmatmul.mubr.msk.bf16.gmra.mxu0 %vm282_vm3, %v1249_v51  ;;  %1155 = vmatmul.mubr.msk.bf16.gmra.mxu1 %vm282_vm3, %v1337_v12 }
  0x71   : > { %1196 = vmatprep.mubr.msk.bf16.mxu0 %vm1262_vm1, %v1261_v1  ;;  %1158 = vmatprep.mubr.msk.bf16.mxu1 %vm1262_vm1, %v1261_v1 }
  0x78   : > { %1197 = vmatmul.mubr.msk.bf16.gmra.mxu0 %vm282_vm3, %v1251_v52  ;;  %1159 = vmatmul.mubr.msk.bf16.gmra.mxu1 %vm282_vm3, %v1250_v53 }
  0x79   : > { %1200 = vmatprep.mubr.msk.bf16.mxu0 %vm1262_vm1, %v1261_v1 }
  0x80   : > { %1201 = vmatmul.mubr.msk.bf16.gmra.mxu0 %vm282_vm3, %v1252_v54 }
  0xd8   : > { %v348_v55 = vpop.f32.mrf.mxu0  ;;  %v1469_v56 = vpop.f32.mrf.mxu1 }
  0xda   : > { %v1086_v57 = vpop.f32.mrf.mxu0  ;;  %v1106_v58 = vpop.f32.mrf.mxu1 }
  0xdc   : > { %v351_v59 = vpop.f32.mrf.mxu0  ;;  %v1471_v60 = vpop.f32.mrf.mxu1 }
  0xde   : > { %v1087_v61 = vpop.f32.mrf.mxu0  ;;  %v1107_v62 = vpop.f32.mrf.mxu1 }
  0xe0   : > { %v356_v63 = vpop.f32.mrf.mxu0  ;;  %v1473_v0 = vpop.f32.mrf.mxu1 }
  0xe2   : > { %v1090_v2 = vpop.f32.mrf.mxu0  ;;  %v1110_v3 = vpop.f32.mrf.mxu1 }
  0xe4   : > { %v359_v4 = vpop.f32.mrf.mxu0  ;;  %v1475_v1 = vpop.f32.mrf.mxu1 }
  0xe6   : > { %v1091_v5 = vpop.f32.mrf.mxu0  ;;  %v1111_v6 = vpop.f32.mrf.mxu1 }
  0xe8   : > { %v1477_v7 = vpop.f32.mrf.mxu0  ;;  %v1479_v8 = vpop.f32.mrf.mxu1 }
  0xea   : > { %v1094_v9 = vpop.f32.mrf.mxu0  ;;  %v1114_v10 = vpop.f32.mrf.mxu1 }
  0xec   : > { %v1481_v11 = vpop.f32.mrf.mxu0  ;;  %v1483_v12 = vpop.f32.mrf.mxu1 }
  0xee   : > { %v1095_v13 = vpop.f32.mrf.mxu0  ;;  %v1115_v14 = vpop.f32.mrf.mxu1 }
  0xf0   : > { %v1485_v15 = vpop.f32.mrf.mxu0  ;;  %v1487_v16 = vpop.f32.mrf.mxu1 }
  0xf2   : > { %v1098_v17 = vpop.f32.mrf.mxu0  ;;  %v1118_v18 = vpop.f32.mrf.mxu1 }
  0xf4   : > { %v1489_v19 = vpop.f32.mrf.mxu0  ;;  %v415_v20 = vpop.f32.mrf.mxu1 }
  0xf6   : > { %v1099_v21 = vpop.f32.mrf.mxu0  ;;  %v1119_v22 = vpop.f32.mrf.mxu1 }
  0xf8   : > { %v1491_v23 = vpop.f32.mrf.mxu0  ;;  %v513_v24 = vpop.f32.mrf.mxu1 }
  0xf9   : > { %v514_v30 = vadd.f32 %v513_v24, %v348_v55 }
  0xfa   : > { %v1102_v25 = vpop.f32.mrf.mxu0  ;;  %v1128_v26 = vpop.f32.mrf.mxu1 }
  0xfc   : > { %v1493_v27 = vpop.f32.mrf.mxu0  ;;  %v516_v28 = vpop.f32.mrf.mxu1 }
  0xfd   : > { %v517_v37 = vadd.f32 %v516_v28, %v351_v59 }
  0xfe   : > { %v1103_v29 = vpop.f32.mrf.mxu0  ;;  %v1129_v31 = vpop.f32.mrf.mxu1 }
 0x100   : > { %v728_v32 = vpop.f32.mrf.mxu0  ;;  %v521_v34 = vpop.f32.mrf.mxu1 }
 0x101   : > { %v798_v35 = vadd.f32 %v728_v32, %v514_v30  ;;  %v522_v45 = vadd.f32 %v521_v34, %v356_v63 }
 0x102   : > { %v1170_v36 = vpop.f32.mrf.mxu0  ;;  %v1132_v39 = vpop.f32.mrf.mxu1 }
 0x103   : > { %v822_v38 = vadd.f32 %v1498_v33, %v798_v35 }
 0x104   : > { %v731_v40 = vpop.f32.mrf.mxu0  ;;  %v524_v42 = vpop.f32.mrf.mxu1 }
 0x105   : > { %vm839_vm4 = vcmp.ge.f32.partialorder %v822_v38, 0.0  ;;  %v856_v41 = vmul.f32 0.1, %v822_v38  ;;  %v799_v43 = vadd.f32 %v731_v40, %v517_v37  ;;  %v525_v54 = vadd.f32 %v524_v42, %v359_v4 }
 0x106   : > { %v1171_v44 = vpop.f32.mrf.mxu0  ;;  %v1133_v48 = vpop.f32.mrf.mxu1 }
 0x107   : > { %v873_v46 = vsel %vm839_vm4, %v822_v38, %v856_v41  ;;  %v823_v47 = vadd.f32 %v1498_v33, %v799_v43 }
 0x108   : > { %891 = vst.msk [vmem:[%s1505_s16] sm:$0xff] %vm890_vm5, %v873_v46  ;;  %v736_v49 = vpop.f32.mrf.mxu0  ;;  %v529_v51 = vpop.f32.mrf.mxu1 }
 0x109   : > { %vm840_vm6 = vcmp.ge.f32.partialorder %v823_v47, 0.0  ;;  %v857_v50 = vmul.f32 0.1, %v823_v47  ;;  %v800_v52 = vadd.f32 %v736_v49, %v522_v45  ;;  %v530_v3 = vadd.f32 %v529_v51, %v1477_v7 }
 0x10a   : > { %v1174_v53 = vpop.f32.mrf.mxu0  ;;  %v1136_v58 = vpop.f32.mrf.mxu1 }
 0x10b   : > { %v874_v55 = vsel %vm840_vm6, %v823_v47, %v857_v50  ;;  %v824_v57 = vadd.f32 %v1498_v33, %v800_v52 }
 0x10c   : > { %892 = vst.msk [vmem:[%s1505_s16 + $0x8] sm:$0xff] %vm890_vm5, %v874_v55  ;;  %v739_v59 = vpop.f32.mrf.mxu0  ;;  %v532_v62 = vpop.f32.mrf.mxu1 }
 0x10d   : > { %vm841_vm7 = vcmp.ge.f32.partialorder %v824_v57, 0.0  ;;  %v858_v61 = vmul.f32 0.1, %v824_v57  ;;  %v801_v63 = vadd.f32 %v739_v59, %v525_v54  ;;  %v533_v18 = vadd.f32 %v532_v62, %v1481_v11 }
 0x10e   : > { %v1175_v2 = vpop.f32.mrf.mxu0  ;;  %v1137_v9 = vpop.f32.mrf.mxu1 }
 0x10f   : > { %v875_v5 = vsel %vm841_vm7, %v824_v57, %v858_v61  ;;  %v825_v6 = vadd.f32 %v1498_v33, %v801_v63  ;;  %vm907_vm7 = vcmask 58368  }
 0x110   : > { %893 = vst.msk [vmem:[%s1505_s16 + $0x10] sm:$0xff] %vm890_vm5, %v875_v5  ;;  %v744_v4 = vpop.f32.mrf.mxu0  ;;  %v537_v13 = vpop.f32.mrf.mxu1 }
 0x111   : > { %vm842_vm8 = vcmp.ge.f32.partialorder %v825_v6, 0.0  ;;  %v859_v10 = vmul.f32 0.1, %v825_v6  ;;  %v802_v14 = vadd.f32 %v744_v4, %v530_v3  ;;  %v538_v29 = vadd.f32 %v537_v13, %v1485_v15 }
 0x112   : > { %v1178_v17 = vpop.f32.mrf.mxu0  ;;  %v1140_v22 = vpop.f32.mrf.mxu1 }
 0x113   : > { %v876_v20 = vsel %vm842_vm8, %v825_v6, %v859_v10  ;;  %v826_v21 = vadd.f32 %v1498_v33, %v802_v14 }
 0x114   : > { %894 = vst.msk [vmem:[%s1505_s16 + $0x18] sm:$0xff] %vm890_vm5, %v876_v20  ;;  %v747_v7 = vpop.f32.mrf.mxu0  ;;  %v540_v25 = vpop.f32.mrf.mxu1 }
 0x115   : > { %vm843_vm9 = vcmp.ge.f32.partialorder %v826_v21, 0.0  ;;  %v860_v24 = vmul.f32 0.1, %v826_v21  ;;  %v803_v26 = vadd.f32 %v747_v7, %v533_v18  ;;  %v541_v38 = vadd.f32 %v540_v25, %v1489_v19 }
 0x116   : > { %v1179_v28 = vpop.f32.mrf.mxu0  ;;  %v1141_v32 = vpop.f32.mrf.mxu1 }
 0x117   : > { %v877_v30 = vsel %vm843_vm9, %v826_v21, %v860_v24  ;;  %v827_v31 = vadd.f32 %v1498_v33, %v803_v26 }
 0x118   : > { %895 = vst.msk [vmem:[%s1505_s16 + $0x20] sm:$0xff] %vm890_vm5, %v877_v30  ;;  %v752_v11 = vpop.f32.mrf.mxu0  ;;  %v545_v35 = vpop.f32.mrf.mxu1 }
 0x119   : > { %vm844_vm10 = vcmp.ge.f32.partialorder %v827_v31, 0.0  ;;  %v861_v34 = vmul.f32 0.1, %v827_v31  ;;  %v804_v36 = vadd.f32 %v752_v11, %v538_v29  ;;  %v546_v46 = vadd.f32 %v545_v35, %v1491_v23 }
 0x11a   : > { %v1182_v37 = vpop.f32.mrf.mxu0  ;;  %v1144_v41 = vpop.f32.mrf.mxu1 }
 0x11b   : > { %v878_v39 = vsel %vm844_vm10, %v827_v31, %v861_v34  ;;  %v828_v40 = vadd.f32 %v1498_v33, %v804_v36 }
 0x11c   : > { %896 = vst.msk [vmem:[%s1505_s16 + $0x28] sm:$0xff] %vm890_vm5, %v878_v39  ;;  %v755_v15 = vpop.f32.mrf.mxu0  ;;  %v548_v43 = vpop.f32.mrf.mxu1 }
 0x11d   : > { %vm845_vm11 = vcmp.ge.f32.partialorder %v828_v40, 0.0  ;;  %v862_v42 = vmul.f32 0.1, %v828_v40  ;;  %v805_v44 = vadd.f32 %v755_v15, %v541_v38  ;;  %v549_v54 = vadd.f32 %v548_v43, %v1493_v27 }
 0x11e   : > { %v1183_v45 = vpop.f32.mrf.mxu0  ;;  %v1145_v49 = vpop.f32.mrf.mxu1 }
 0x11f   : > { %v879_v47 = vsel %vm845_vm11, %v828_v40, %v862_v42  ;;  %v829_v48 = vadd.f32 %v1498_v33, %v805_v44 }
 0x120   : > { %897 = vst.msk [vmem:[%s1505_s16 + $0x30] sm:$0xff] %vm890_vm5, %v879_v47  ;;  %v760_v19 = vpop.f32.mrf.mxu0  ;;  %v553_v51 = vpop.f32.mrf.mxu1 }
 0x121   : > { %vm846_vm12 = vcmp.ge.f32.partialorder %v829_v48, 0.0  ;;  %v863_v50 = vmul.f32 0.1, %v829_v48  ;;  %v806_v52 = vadd.f32 %v760_v19, %v546_v46  ;;  %v554_v2 = vadd.f32 %v553_v51, %v1469_v56 }
 0x122   : > { %v1186_v53 = vpop.f32.mrf.mxu0  ;;  %v1148_v58 = vpop.f32.mrf.mxu1 }
 0x123   : > { %v880_v55 = vsel %vm846_vm12, %v829_v48, %v863_v50  ;;  %v830_v57 = vadd.f32 %v1498_v33, %v806_v52 }
 0x124   : > { %898 = vst.msk [vmem:[%s1505_s16 + $0x38] sm:$0xff] %vm890_vm5, %v880_v55  ;;  %v763_v23 = vpop.f32.mrf.mxu0  ;;  %v556_v61 = vpop.f32.mrf.mxu1 }
 0x125   : > { %vm847_vm13 = vcmp.ge.f32.partialorder %v830_v57, 0.0  ;;  %v864_v59 = vmul.f32 0.1, %v830_v57  ;;  %v807_v62 = vadd.f32 %v763_v23, %v549_v54  ;;  %v557_v14 = vadd.f32 %v556_v61, %v1471_v60 }
 0x126   : > { %v1187_v63 = vpop.f32.mrf.mxu0  ;;  %v1149_v6 = vpop.f32.mrf.mxu1 }
 0x127   : > { %v881_v3 = vsel %vm847_vm13, %v830_v57, %v864_v59  ;;  %v831_v5 = vadd.f32 %v1498_v33, %v807_v62 }
 0x128   : > { %899 = vst.msk [vmem:[%s1505_s16 + $0x40] sm:$0xff] %vm890_vm5, %v881_v3  ;;  %v768_v27 = vpop.f32.mrf.mxu0  ;;  %v561_v4 = vpop.f32.mrf.mxu1 }
 0x129   : > { %vm848_vm14 = vcmp.ge.f32.partialorder %v831_v5, 0.0  ;;  %v865_v9 = vmul.f32 0.1, %v831_v5  ;;  %v808_v10 = vadd.f32 %v768_v27, %v554_v2  ;;  %v562_v25 = vadd.f32 %v561_v4, %v1473_v0 }
 0x12a   : > { %v1190_v13 = vpop.f32.mrf.mxu0  ;;  %v1152_v20 = vpop.f32.mrf.mxu1 }
 0x12b   : > { %v882_v17 = vsel %vm848_vm14, %v831_v5, %v865_v9  ;;  %v832_v18 = vadd.f32 %v1498_v33, %v808_v10 }
 0x12c   : > { %900 = vst.msk [vmem:[%s1505_s16 + $0x48] sm:$0xff] %vm890_vm5, %v882_v17  ;;  %v771_v56 = vpop.f32.mrf.mxu0  ;;  %v564_v22 = vpop.f32.mrf.mxu1 }
 0x12d   : > { %vm849_vm15 = vcmp.ge.f32.partialorder %v832_v18, 0.0  ;;  %v866_v21 = vmul.f32 0.1, %v832_v18  ;;  %v809_v7 = vadd.f32 %v771_v56, %v557_v14  ;;  %v565_v34 = vadd.f32 %v564_v22, %v1475_v1 }
 0x12e   : > { %v1191_v24 = vpop.f32.mrf.mxu0  ;;  %v1153_v29 = vpop.f32.mrf.mxu1 }
 0x12f   : > { %v883_v26 = vsel %vm849_vm15, %v832_v18, %v866_v21  ;;  %v833_v28 = vadd.f32 %v1498_v33, %v809_v7 }
 0x130   : > { %901 = vst.msk [vmem:[%s1505_s16 + $0x50] sm:$0xff] %vm890_vm5, %v883_v26  ;;  %v776_v60 = vpop.f32.mrf.mxu0  ;;  %v569_v31 = vpop.f32.mrf.mxu1 }
 0x131   : > { %vm850_vm0 = vcmp.ge.f32.partialorder %v833_v28, 0.0  ;;  %v867_v30 = vmul.f32 0.1, %v833_v28  ;;  %v810_v32 = vadd.f32 %v776_v60, %v562_v25  ;;  %v570_v15 = vadd.f32 %v569_v31, %v1479_v8 }
 0x132   : > { %v1194_v11 = vpop.f32.mrf.mxu0  ;;  %v1156_v37 = vpop.f32.mrf.mxu1 }
 0x133   : > { %v884_v35 = vsel %vm850_vm0, %v833_v28, %v867_v30  ;;  %v834_v36 = vadd.f32 %v1498_v33, %v810_v32 }
 0x134   : > { %902 = vst.msk [vmem:[%s1505_s16 + $0x58] sm:$0xff] %vm890_vm5, %v884_v35  ;;  %v779_v0 = vpop.f32.mrf.mxu0  ;;  %v572_v39 = vpop.f32.mrf.mxu1 }
 0x135   : > { %vm851_vm1 = vcmp.ge.f32.partialorder %v834_v36, 0.0  ;;  %v868_v38 = vmul.f32 0.1, %v834_v36  ;;  %v811_v40 = vadd.f32 %v779_v0, %v565_v34  ;;  %v573_v49 = vadd.f32 %v572_v39, %v1483_v12 }
 0x136   : > { %v1195_v41 = vpop.f32.mrf.mxu0  ;;  %v1157_v44 = vpop.f32.mrf.mxu1 }
 0x137   : > { %v885_v42 = vsel %vm851_vm1, %v834_v36, %v868_v38  ;;  %v835_v43 = vadd.f32 %v1498_v33, %v811_v40 }
 0x138   : > { %903 = vst.msk [vmem:[%s1505_s16 + $0x60] sm:$0xff] %vm890_vm5, %v885_v42  ;;  %v784_v1 = vpop.f32.mrf.mxu0  ;;  %v577_v46 = vpop.f32.mrf.mxu1 }
 0x139   : > { %vm852_vm2 = vcmp.ge.f32.partialorder %v835_v43, 0.0  ;;  %v869_v45 = vmul.f32 0.1, %v835_v43  ;;  %v812_v47 = vadd.f32 %v784_v1, %v570_v15  ;;  %v578_v57 = vadd.f32 %v577_v46, %v1487_v16 }
 0x13a   : > { %v1198_v48 = vpop.f32.mrf.mxu0  ;;  %v1160_v51 = vpop.f32.mrf.mxu1 }
 0x13b   : > { %v886_v19 = vsel %vm852_vm2, %v835_v43, %v869_v45  ;;  %v836_v50 = vadd.f32 %v1498_v33, %v812_v47 }
 0x13c   : > { %904 = vst.msk [vmem:[%s1505_s16 + $0x68] sm:$0xff] %vm890_vm5, %v886_v19  ;;  %v787_v8 = vpop.f32.mrf.mxu0  ;;  %v580_v54 = vpop.f32.mrf.mxu1 }
 0x13d   : > { %vm853_vm3 = vcmp.ge.f32.partialorder %v836_v50, 0.0  ;;  %v870_v52 = vmul.f32 0.1, %v836_v50  ;;  %v813_v53 = vadd.f32 %v787_v8, %v573_v49 }
 0x13e   : > { %v1199_v55 = vpop.f32.mrf.mxu0  ;;  %v1161_v59 = vpop.f32.mrf.mxu1 }
 0x13f   : > { %v887_v58 = vsel %vm853_vm3, %v836_v50, %v870_v52  ;;  %v837_v23 = vadd.f32 %v1498_v33, %v813_v53 }
 0x140   : > { %905 = vst.msk [vmem:[%s1505_s16 + $0x70] sm:$0xff] %vm890_vm5, %v887_v58  ;;  %v792_v12 = vpop.f32.mrf.mxu0 }
 0x141   : > { %vm854_vm4 = vcmp.ge.f32.partialorder %v837_v23, 0.0  ;;  %v871_v61 = vmul.f32 0.1, %v837_v23  ;;  %v814_v62 = vadd.f32 %v792_v12, %v578_v57 }
 0x142   : > { %v1202_v63 = vpop.f32.mrf.mxu0 }
 0x143   : > { %v888_v2 = vsel %vm854_vm4, %v837_v23, %v871_v61  ;;  %v838_v3 = vadd.f32 %v1498_v33, %v814_v62 }
 0x144   : > { %906 = vst.msk [vmem:[%s1505_s16 + $0x78] sm:$0xff] %vm890_vm5, %v888_v2  ;;  %v795_v5 = vpop.f32.mrf.mxu0 }
 0x145   : > { %vm855_vm6 = vcmp.ge.f32.partialorder %v838_v3, 0.0  ;;  %v872_v16 = vmul.f32 0.1, %v838_v3 }
 0x146   : > { %v1203_v6 = vpop.f32.mrf.mxu0 }
 0x147   : > { %v889_v27 = vsel %vm855_vm6, %v838_v3, %v872_v16 }
 0x148   : > { %908 = vst.msk [vmem:[%s1505_s16 + $0x80] sm:$0x3] %vm907_vm7, %v889_v27 }
 0x149 PF: > { %s13_s12 = sadd.s32 1, %s1259_s12  }
 0x14a   : > { %p10_p4 = scmp.ge.s32.totalorder %s13_s12, 4  }
 0x14c   :  { %12 = sbr.rel (!%p10_p4) target bundleno = 1 (0x1), region = 64 }

</bundles_post_ra>
